<compile_context>
chip_gen: v7x
topology: tpu7x:2x2x1
jax: 0.10.0
libtpu: 0.0.40
codegen_flags: <defaults>
</compile_context>

<pallas_src>
import functools

import jax
import jax.numpy as jnp
from jax.experimental import pallas as pl
from jax.experimental.pallas import tpu as pltpu


def _round_up(x, m):
    return -(-x // m) * m


_VMEM_CFG = None


def _vmem_limits():
    """(vmem_limit_bytes, tile-sizing budget), generation aware."""
    global _VMEM_CFG
    if _VMEM_CFG is None:
        try:
            cap = pltpu.get_tpu_info().vmem_capacity_bytes
        except Exception:
            cap = 64 * 1024 * 1024
        if cap >= 96 * 1024 * 1024:            # v5e / v6e: 128 MiB physical VMEM
            _VMEM_CFG = (100 * 1024 * 1024, 64 * 1024 * 1024)
        else:                                   # v7x: 64 MiB per TensorCore
            _VMEM_CFG = (44 * 1024 * 1024, 24 * 1024 * 1024)
    return _VMEM_CFG


# ----------------------------- FPS Pallas kernel -----------------------------

def _fps_kernel(xyzT_ref, out_ref, dist_ref, far_ref, *, n_valid):
    """One batch per grid step.  xyzT_ref: [1, 3, Np] f32; out_ref: [1, 1, npoint] i32."""
    xyzT = xyzT_ref[0]                                            # [3, Np]
    n_pad = xyzT.shape[1]
    npoint = out_ref.shape[2]

    lane = jax.lax.broadcasted_iota(jnp.int32, (1, n_pad), 1)
    lane_f = lane.astype(jnp.float32)
    out_lane = jax.lax.broadcasted_iota(jnp.int32, (1, npoint), 1)
    big = jnp.float32(1e9)

    # Padded columns start at -1 so they can never win the argmax.
    dist_ref[...] = jnp.where(lane < n_valid, jnp.float32(1e10), jnp.float32(-1.0))
    # TODO(synk): PyTorch seeds the first centroid with torch.randint; use 0 for determinism.
    far_ref[...] = jnp.zeros((1, 1), jnp.int32)
    out_ref[0] = jnp.zeros((1, npoint), jnp.int32)

    @pl.loop(0, npoint)
    def _(i):
        far = far_ref[...]                                        # [1, 1] int32
        out_ref[0] = jnp.where(out_lane == i, far, out_ref[0])
        # centroid coordinates via a masked lane reduction (no dynamic indexing)
        hit = lane == far                                         # [1, Np]
        cxyz = jnp.sum(jnp.where(hit, xyzT, 0.0), axis=1, keepdims=True)   # [3, 1]
        d = jnp.zeros((1, n_pad), jnp.float32)
        for c in range(3):                                        # static unroll (VPU)
            diff = xyzT[c:c + 1, :] - cxyz[c:c + 1, :]
            d = d + diff * diff
        nd = jnp.minimum(dist_ref[...], d)
        dist_ref[...] = nd
        m = jnp.max(nd, axis=1, keepdims=True)
        pos = jnp.min(jnp.where(nd == m, lane_f, big), axis=1, keepdims=True)
        far_ref[...] = pos.astype(jnp.int32)


def farthest_point_sample(xyzT, npoint, n_valid):
    """xyzT: [B, 3, Np] padded/transposed coords -> [B, npoint] int32 indices."""
    B, _, n_pad = xyzT.shape
    limit, _ = _vmem_limits()
    out = pl.pallas_call(
        functools.partial(_fps_kernel, n_valid=n_valid),
        out_shape=jax.ShapeDtypeStruct((B, 1, npoint), jnp.int32),
        grid=(B,),
        in_specs=[pl.BlockSpec((1, 3, n_pad), lambda b: (b, 0, 0))],
        out_specs=pl.BlockSpec((1, 1, npoint), lambda b: (b, 0, 0)),
        scratch_shapes=[pltpu.VMEM((1, n_pad), jnp.float32),
                        pltpu.VMEM((1, 1), jnp.int32)],
        compiler_params=pltpu.CompilerParams(
            dimension_semantics=("parallel",), vmem_limit_bytes=limit),
    )(xyzT)
    return out.reshape(B, npoint)


# -------------------- fused distance + kNN Pallas kernel ---------------------

def _knn_kernel(src_ref, dstT_ref, idx_ref, best_d_ref, best_i_ref, *, n_valid):
    """Pairwise squared distance + running top-nsample (min) selection.

    Grid (B, query tiles, N tiles); N is the last ("arbitrary") axis.  Running best
    distances/indices live in VMEM scratch; only the int32 index tile is written, on
    the final N step.  The full [B, k, N] distance matrix never exists.
    """
    ni = pl.program_id(2)
    tq, ns = best_d_ref.shape
    tn = dstT_ref.shape[2]

    @pl.when(ni == 0)
    def _():
        best_d_ref[...] = jnp.full((tq, ns), jnp.inf, jnp.float32)
        best_i_ref[...] = jnp.zeros((tq, ns), jnp.int32)

    src = src_ref[0]                                              # [tq, 3]
    dstT = dstT_ref[0]                                            # [3, tn]

    # K=3 contraction as 3 unrolled VPU passes (MXU would be <2% utilised).
    d = jnp.zeros((tq, tn), jnp.float32)
    for c in range(3):
        diff = src[:, c:c + 1] - dstT[c:c + 1, :]
        d = d + diff * diff

    base = ni * tn
    col = jax.lax.broadcasted_iota(jnp.int32, (tq, tn), 1)
    col_f = col.astype(jnp.float32)
    d = jnp.where(col + base < n_valid, d, jnp.float32(jnp.inf))  # mask padded columns

    run_d = best_d_ref[...]
    run_i = best_i_ref[...]
    slot = jax.lax.broadcasted_iota(jnp.int32, (tq, ns), 1)
    slot_f = slot.astype(jnp.float32)
    big = jnp.float32(1e9)

    new_d = jnp.zeros((tq, ns), jnp.float32)
    new_i = jnp.zeros((tq, ns), jnp.int32)
    for s in range(ns):                       # static unroll: ns extract-min merges
        tm = jnp.min(d, axis=1, keepdims=True)                    # [tq, 1]
        rm = jnp.min(run_d, axis=1, keepdims=True)
        take_tile = tm < rm                   # ties keep the (earlier) running entry
        sel_d = jnp.minimum(tm, rm)
        tpos = jnp.min(jnp.where(d == tm, col_f, big), axis=1, keepdims=True)
        rpos = jnp.min(jnp.where(run_d == rm, slot_f, big), axis=1, keepdims=True)
        ti = tpos.astype(jnp.int32) + base
        ri = jnp.sum(jnp.where(slot_f == rpos, run_i, 0), axis=1, keepdims=True)
        sel_i = jnp.where(take_tile, ti, ri)
        new_d = jnp.where(slot == s, sel_d, new_d)
        new_i = jnp.where(slot == s, sel_i, new_i)
        d = jnp.where((col_f == tpos) & take_tile, jnp.float32(jnp.inf), d)
        run_d = jnp.where((slot_f == rpos) & jnp.logical_not(take_tile),
                          jnp.float32(jnp.inf), run_d)

    best_d_ref[...] = new_d
    best_i_ref[...] = new_i

    @pl.when(ni == pl.num_programs(2) - 1)
    def _():
        idx_ref[0] = best_i_ref[...]


def knn_indices(new_xyz, xyzT, nsample, n_valid):
    """new_xyz: [B, K, 3] queries, xyzT: [B, 3, Np] -> idx [B, K, nsample] int32."""
    B, K, _ = new_xyz.shape
    n_pad = xyzT.shape[2]
    k_pad = _round_up(K, 8)
    src = new_xyz if k_pad == K else jnp.pad(new_xyz, ((0, 0), (0, k_pad - K), (0, 0)))

    tq = max(d for d in range(8, min(k_pad, 128) + 1, 8) if k_pad % d == 0)
    tn = 128
    for cand in (1024, 512, 256):
        if n_pad % cand == 0:
            tn = cand
            break

    limit, _ = _vmem_limits()
    idx = pl.pallas_call(
        functools.partial(_knn_kernel, n_valid=n_valid),
        out_shape=jax.ShapeDtypeStruct((B, k_pad, nsample), jnp.int32),
        grid=(B, k_pad // tq, n_pad // tn),
        in_specs=[pl.BlockSpec((1, tq, 3), lambda b, q, n: (b, q, 0)),
                  pl.BlockSpec((1, 3, tn), lambda b, q, n: (b, 0, n))],
        out_specs=pl.BlockSpec((1, tq, nsample), lambda b, q, n: (b, q, 0)),
        scratch_shapes=[pltpu.VMEM((tq, nsample), jnp.float32),
                        pltpu.VMEM((tq, nsample), jnp.int32)],
        compiler_params=pltpu.CompilerParams(
            dimension_semantics=("parallel", "parallel", "arbitrary"),
            vmem_limit_bytes=limit),
    )(src, xyzT)
    return idx[:, :K, :]


# ------------------------ grouped-feature MLP kernel -------------------------

def _sa_mlp_kernel(x_ref, w1_ref, t1_ref, w2_ref, t2_ref, o_ref):
    """(1x1 conv w/ folded BN scale, +shift, ReLU) x2 + max over the nsample axis.

    x_ref: [1, ns, tq, cin] bf16 (neighbour-major); o_ref: [1, tq, c2p] f32.
    The max-pool is fused into the per-neighbour loop -> no in-kernel reshape."""
    ns = x_ref.shape[1]
    w1 = w1_ref[...]
    t1 = t1_ref[...]
    w2 = w2_ref[...]
    t2 = t2_ref[...]
    acc = None
    for j in range(ns):                                           # static unroll
        x = x_ref[0, j]                                           # [tq, cin] bf16
        h = jnp.dot(x, w1, preferred_element_type=jnp.float32)
        h = jnp.maximum(h + t1, 0.0)
        h = jnp.dot(h.astype(jnp.bfloat16), w2, preferred_element_type=jnp.float32)
        h = jnp.maximum(h + t2, 0.0)
        acc = h if acc is None else jnp.maximum(acc, h)
    o_ref[0] = acc


def _choose_tq(k_pad, ns, cin, c1p, c2p, budget, B):
    """Points per grid step: honour a VMEM budget, prefer >= 8 total grid steps."""
    cands = sorted((d for d in range(8, k_pad + 1, 8) if k_pad % d == 0), reverse=True)
    if not cands:
        cands = [k_pad]

    def pad8(v):
        return _round_up(v, 8)

    def pad128(v):
        return _round_up(v, 128)

    def vmem_use(tq):
        x_blk = ns * pad8(tq) * pad128(cin) * 2                   # bf16 input block
        w_blk = pad8(cin) * c1p * 2 + c1p * c2p * 2 + 8 * (c1p + c2p) * 4
        o_blk = pad8(tq) * c2p * 4
        inter = pad8(tq) * (c1p + c2p) * 4
        return 2 * x_blk + 2 * w_blk + 2 * o_blk + inter          # 2x = double buffering

    tq = cands[-1]
    for d in cands:
        if d * ns <= 8192 and vmem_use(d) <= budget:
            tq = d
            break
    # >= ~8 grid steps when the problem is big enough (pipelining; v7x dual core).
    smaller = [d for d in cands if d <= tq and B * (k_pad // d) >= 8]
    if smaller:
        tq = max(smaller)
    return tq


def sa_mlp(feats, params):
    """feats: [B, ns, K, cin] f32 grouped features -> [B, K, c2] (MLP + max pool)."""
    B, ns, K, cin = feats.shape
    w1, s1, t1, w2, s2, t2 = params
    assert w1.shape[0] == cin
    c1, c2 = w1.shape[1], w2.shape[1]
    c1p, c2p = _round_up(c1, 128), _round_up(c2, 128)

    # Fold BN scale into the conv weights (exact, eval-mode BN) and pad channel dims
    # to multiples of 128 so MXU passes and output stores are lane-dense.
    w1b = jnp.zeros((cin, c1p), jnp.float32).at[:, :c1].set(w1 * s1[None, :]).astype(jnp.bfloat16)
    w2b = jnp.zeros((c1p, c2p), jnp.float32).at[:c1, :c2].set(w2 * s2[None, :]).astype(jnp.bfloat16)
    t1r = jnp.zeros((1, c1p), jnp.float32).at[0, :c1].set(t1)
    t2r = jnp.zeros((1, c2p), jnp.float32).at[0, :c2].set(t2)

    k_pad = _round_up(K, 8)
    if k_pad != K:
        feats = jnp.pad(feats, ((0, 0), (0, 0), (0, k_pad - K), (0, 0)))
    x = feats.astype(jnp.bfloat16)

    limit, budget = _vmem_limits()
    tq = _choose_tq(k_pad, ns, cin, c1p, c2p, budget, B)

    out = pl.pallas_call(
        _sa_mlp_kernel,
        out_shape=jax.ShapeDtypeStruct((B, k_pad, c2p), jnp.float32),
        grid=(B, k_pad // tq),
        in_specs=[
            pl.BlockSpec((1, ns, tq, cin), lambda b, i: (b, 0, i, 0)),
            # TODO(synk): use pipeline_mode=pl.Buffered(1) on the resident weight/shift
            # blocks (constant index_map) once single-buffered inputs are universal.
            pl.BlockSpec((cin, c1p), lambda b, i: (0, 0)),
            pl.BlockSpec((1, c1p), lambda b, i: (0, 0)),
            pl.BlockSpec((c1p, c2p), lambda b, i: (0, 0)),
            pl.BlockSpec((1, c2p), lambda b, i: (0, 0)),
        ],
        out_specs=pl.BlockSpec((1, tq, c2p), lambda b, i: (b, i, 0)),
        compiler_params=pltpu.CompilerParams(
            dimension_semantics=("parallel", "parallel"),
            vmem_limit_bytes=limit),
    )(x, w1b, t1r, w2b, t2r)
    return out[:, :K, :c2]


# ------------------------------ plain-JAX glue --------------------------------

def index_points(points, idx):
    """points: [B, N, C], idx: [B, ...] int -> [B, ..., C]."""
    B = points.shape[0]
    bidx = jnp.arange(B).reshape((B,) + (1,) * (idx.ndim - 1))
    return points[bidx, idx]


def transition_down(xyz, points, params, *, npoint, nsample):
    """Forward pass of TransitionDown (PointNetSetAbstraction, knn=True).

    xyz: [B, N, 3], points: [B, N, D]
    returns (new_xyz [B, npoint, 3], new_points [B, npoint, C_out])
    """
    B, N, _ = xyz.shape
    n_pad = _round_up(N, 128)
    xyz_p = xyz if n_pad == N else jnp.pad(xyz, ((0, 0), (0, n_pad - N), (0, 0)))
    xyzT = jnp.transpose(xyz_p, (0, 2, 1))                     # [B, 3, Np], once, in XLA

    fps_idx = farthest_point_sample(xyzT, npoint, n_valid=N)   # Pallas: [B, k]
    new_xyz = index_points(xyz, fps_idx)                       # [B, k, 3]

    idx = knn_indices(new_xyz, xyzT, nsample, n_valid=N)       # Pallas: [B, k, ns]

    # Neighbour-major grouping so the MLP kernel's max-pool is an unrolled maximum
    # over per-neighbour slices (no in-kernel reshape / relayout).
    # TODO(synk): fuse this gather/concat into sa_mlp via scalar-prefetched indices +
    # manual DMA so the grouped tensor never round-trips HBM.
    idx_t = jnp.transpose(idx, (0, 2, 1))                      # [B, ns, k]
    grouped_xyz = index_points(xyz, idx_t)                     # [B, ns, k, 3]
    grouped_xyz_norm = grouped_xyz - new_xyz[:, None, :, :]
    grouped_points = index_points(points, idx_t)               # [B, ns, k, D]
    new_points = jnp.concatenate([grouped_xyz_norm, grouped_points], axis=-1)

    pooled = sa_mlp(new_points, params)                        # Pallas: [B, k, C_out]
    return new_xyz, pooled


def init_params(key, channels, eps=1e-5):
    """Deterministic Conv2d(1x1)+BatchNorm2d params, folded to (W, scale, shift)."""
    c_in = channels[0]
    folded = []
    for c_out in channels[1:]:
        key, kw, kb, kg, kbt, km, kv = jax.random.split(key, 7)
        w = jax.random.normal(kw, (c_out, c_in), jnp.float32) * 0.1   # conv weight [out,in,1,1]
        b = jax.random.normal(kb, (c_out,), jnp.float32) * 0.01       # conv bias
        gamma = jax.random.uniform(kg, (c_out,), jnp.float32, 0.5, 1.5)
        beta = jax.random.normal(kbt, (c_out,), jnp.float32) * 0.01
        rmean = jax.random.normal(km, (c_out,), jnp.float32) * 0.01
        rvar = jax.random.uniform(kv, (c_out,), jnp.float32, 0.5, 1.5)
        scale = gamma / jnp.sqrt(rvar + eps)
        shift = beta + (b - rmean) * scale
        folded.extend([w.T, scale, shift])                     # W stored as [c_in, c_out]
        c_in = c_out
    return tuple(folded)


# ----------------------------------- main -------------------------------------

if __name__ == "__main__":
    key = jax.random.PRNGKey(0)
    B, N, D = 2, 16, 13           # batch, input points, feature channels
    k_pts, nneighbor = 8, 4       # TransitionDown(k=8, nneighbor=4, ...)
    channels = (3 + D, 32, 32)    # channels[0] must equal 3 + feature dim

    kx, kp, kw = jax.random.split(key, 3)
    xyz = jax.random.normal(kx, (B, N, 3), jnp.float32)
    points = jax.random.normal(kp, (B, N, D), jnp.float32)
    params = init_params(kw, channels)

    fwd = jax.jit(functools.partial(transition_down, npoint=k_pts, nsample=nneighbor))
    new_xyz, new_points = fwd(xyz, points, params)
    jax.block_until_ready((new_xyz, new_points))

    assert new_xyz.shape == (B, k_pts, 3)
    assert new_points.shape == (B, k_pts, channels[-1])
    assert bool(jnp.isfinite(new_points).all())
    print("KERNEL_OK")
</pallas_src>

<mosaic_0001>
module attributes {stable_mosaic.version = 11 : i64} {
  func.func @_fps_kernel(%arg0: i32, %arg1: memref<1x3x128xf32, #tpu.memory_space<vmem>>, %arg2: memref<1x1x8xi32, #tpu.memory_space<vmem>>, %arg3: memref<1x128xf32, #tpu.memory_space<vmem>>, %arg4: memref<1x1xi32, #tpu.memory_space<vmem>>) attributes {dimension_semantics = [#tpu.dimension_semantics<parallel>], iteration_bounds = array<i64: 2>, scalar_prefetch = 0 : i64, scratch_operands = 2 : i64, tpu.core_type = #tpu.core_type<tc>, window_params = [{transform_indices = @transform_0, window_bounds = array<i64: 1, 3, 128>}, {transform_indices = @transform_1, window_bounds = array<i64: 1, 1, 8>}]} {
    %c0 = arith.constant 0 : index
    %c0_0 = arith.constant 0 : index
    %c0_1 = arith.constant 0 : index
    %0 = vector.load %arg1[%c0, %c0_0, %c0_1] : memref<1x3x128xf32, #tpu.memory_space<vmem>>, vector<1x3x128xf32>
    %1 = vector.shape_cast %0 : vector<1x3x128xf32> to vector<3x128xf32>
    %2 = tpu.iota {dimensions = array<i32: 1>} : vector<1x128xi32>
    %3 = arith.sitofp %2 : vector<1x128xi32> to vector<1x128xf32>
    %4 = tpu.iota {dimensions = array<i32: 1>} : vector<1x8xi32>
    %c16_i32 = arith.constant 16 : i32
    %5 = vector.broadcast %c16_i32 : i32 to vector<1x128xi32>
    %6 = arith.cmpi slt, %2, %5 : vector<1x128xi32>
    %cst = arith.constant 1.000000e+10 : f32
    %cst_2 = arith.constant -1.000000e+00 : f32
    %7 = vector.broadcast %cst : f32 to vector<1x128xf32>
    %8 = vector.broadcast %cst_2 : f32 to vector<1x128xf32>
    %9 = arith.select %6, %7, %8 : vector<1x128xi1>, vector<1x128xf32>
    %c0_3 = arith.constant 0 : index
    %c0_4 = arith.constant 0 : index
    %10 = vector.load %arg3[%c0_3, %c0_4] : memref<1x128xf32, #tpu.memory_space<vmem>>, vector<1x128xf32>
    tpu.vector_store %arg3[%c0_3, %c0_4], %9 {strides = array<i32>} : memref<1x128xf32, #tpu.memory_space<vmem>>, vector<1x128xf32>,
    %c0_i32 = arith.constant 0 : i32
    %11 = vector.broadcast %c0_i32 : i32 to vector<1x1xi32>
    %c0_5 = arith.constant 0 : index
    %c0_6 = arith.constant 0 : index
    %12 = vector.load %arg4[%c0_5, %c0_6] : memref<1x1xi32, #tpu.memory_space<vmem>>, vector<1x1xi32>
    tpu.vector_store %arg4[%c0_5, %c0_6], %11 {strides = array<i32>} : memref<1x1xi32, #tpu.memory_space<vmem>>, vector<1x1xi32>,
    %c0_i32_7 = arith.constant 0 : i32
    %13 = vector.broadcast %c0_i32_7 : i32 to vector<1x8xi32>
    %c0_8 = arith.constant 0 : index
    %c0_9 = arith.constant 0 : index
    %c0_10 = arith.constant 0 : index
    %14 = vector.load %arg2[%c0_8, %c0_9, %c0_10] : memref<1x1x8xi32, #tpu.memory_space<vmem>>, vector<1x1x8xi32>
    %15 = vector.shape_cast %14 : vector<1x1x8xi32> to vector<1x8xi32>
    %16 = vector.shape_cast %13 : vector<1x8xi32> to vector<1x1x8xi32>
    tpu.vector_store %arg2[%c0_8, %c0_9, %c0_10], %16 {strides = array<i32>} : memref<1x1x8xi32, #tpu.memory_space<vmem>>, vector<1x1x8xi32>,
    %cst_11 = arith.constant 1.000000e+09 : f32
    %c0_i32_12 = arith.constant 0 : i32
    %c8_i32 = arith.constant 8 : i32
    %17 = arith.addi %c0_i32_12, %c8_i32 : i32
    %c1_i32 = arith.constant 1 : i32
    scf.for %arg5 = %c0_i32_12 to %17 step %c1_i32  : i32 {
      %c1_i32_14 = arith.constant 1 : i32
      %18 = arith.muli %arg5, %c1_i32_14 : i32
      %c0_i32_15 = arith.constant 0 : i32
      %19 = arith.addi %c0_i32_15, %18 : i32
      %c0_16 = arith.constant 0 : index
      %c0_17 = arith.constant 0 : index
      %20 = vector.load %arg4[%c0_16, %c0_17] : memref<1x1xi32, #tpu.memory_space<vmem>>, vector<1x1xi32>
      %21 = vector.broadcast %19 : i32 to vector<1x8xi32>
      %22 = arith.cmpi eq, %4, %21 : vector<1x8xi32>
      %c0_18 = arith.constant 0 : index
      %c0_19 = arith.constant 0 : index
      %c0_20 = arith.constant 0 : index
      %23 = vector.load %arg2[%c0_18, %c0_19, %c0_20] : memref<1x1x8xi32, #tpu.memory_space<vmem>>, vector<1x1x8xi32>
      %24 = vector.shape_cast %23 : vector<1x1x8xi32> to vector<1x8xi32>
      %25 = vector.shape_cast %20 : vector<1x1xi32> to vector<1x1xi32>
      %26 = vector.broadcast %25 : vector<1x1xi32> to vector<1x8xi32>
      %27 = arith.select %22, %26, %24 : vector<1x8xi1>, vector<1x8xi32>
      %c0_21 = arith.constant 0 : index
      %c0_22 = arith.constant 0 : index
      %c0_23 = arith.constant 0 : index
      %28 = vector.load %arg2[%c0_21, %c0_22, %c0_23] : memref<1x1x8xi32, #tpu.memory_space<vmem>>, vector<1x1x8xi32>
      %29 = vector.shape_cast %28 : vector<1x1x8xi32> to vector<1x8xi32>
      %30 = vector.shape_cast %27 : vector<1x8xi32> to vector<1x1x8xi32>
      tpu.vector_store %arg2[%c0_21, %c0_22, %c0_23], %30 {strides = array<i32>} : memref<1x1x8xi32, #tpu.memory_space<vmem>>, vector<1x1x8xi32>,
      %31 = vector.broadcast %20 : vector<1x1xi32> to vector<1x128xi32>
      %32 = arith.cmpi eq, %2, %31 : vector<1x128xi32>
      %cst_24 = arith.constant 0.000000e+00 : f32
      %33 = vector.shape_cast %32 : vector<1x128xi1> to vector<1x128xi1>
      %34 = vector.broadcast %33 : vector<1x128xi1> to vector<3x128xi1>
      %35 = vector.broadcast %cst_24 : f32 to vector<3x128xf32>
      %36 = arith.select %34, %1, %35 : vector<3x128xi1>, vector<3x128xf32>
      %cst_25 = arith.constant dense<0.000000e+00> : vector<3xf32>
      %37 = vector.multi_reduction <add>, %36, %cst_25 [1] : vector<3x128xf32> to vector<3xf32>
      %38 = vector.shape_cast %37 : vector<3xf32> to vector<3x1xf32>
      %cst_26 = arith.constant 0.000000e+00 : f32
      %39 = vector.broadcast %cst_26 : f32 to vector<1x128xf32>
      %40 = vector.extract_strided_slice %1 {offsets = [0, 0], sizes = [1, 128], strides = [1, 1]} : vector<3x128xf32> to vector<1x128xf32>
      %41 = vector.extract_strided_slice %38 {offsets = [0, 0], sizes = [1, 1], strides = [1, 1]} : vector<3x1xf32> to vector<1x1xf32>
      %42 = vector.broadcast %41 : vector<1x1xf32> to vector<1x128xf32>
      %43 = arith.subf %40, %42 : vector<1x128xf32>
      %44 = arith.mulf %43, %43 : vector<1x128xf32>
      %45 = arith.addf %39, %44 : vector<1x128xf32>
      %46 = vector.extract_strided_slice %1 {offsets = [1, 0], sizes = [1, 128], strides = [1, 1]} : vector<3x128xf32> to vector<1x128xf32>
      %47 = vector.extract_strided_slice %38 {offsets = [1, 0], sizes = [1, 1], strides = [1, 1]} : vector<3x1xf32> to vector<1x1xf32>
      %48 = vector.broadcast %47 : vector<1x1xf32> to vector<1x128xf32>
      %49 = arith.subf %46, %48 : vector<1x128xf32>
      %50 = arith.mulf %49, %49 : vector<1x128xf32>
      %51 = arith.addf %45, %50 : vector<1x128xf32>
      %52 = vector.extract_strided_slice %1 {offsets = [2, 0], sizes = [1, 128], strides = [1, 1]} : vector<3x128xf32> to vector<1x128xf32>
      %53 = vector.extract_strided_slice %38 {offsets = [2, 0], sizes = [1, 1], strides = [1, 1]} : vector<3x1xf32> to vector<1x1xf32>
      %54 = vector.broadcast %53 : vector<1x1xf32> to vector<1x128xf32>
      %55 = arith.subf %52, %54 : vector<1x128xf32>
      %56 = arith.mulf %55, %55 : vector<1x128xf32>
      %57 = arith.addf %51, %56 : vector<1x128xf32>
      %c0_27 = arith.constant 0 : index
      %c0_28 = arith.constant 0 : index
      %58 = vector.load %arg3[%c0_27, %c0_28] : memref<1x128xf32, #tpu.memory_space<vmem>>, vector<1x128xf32>
      %59 = arith.minimumf %58, %57 : vector<1x128xf32>
      %c0_29 = arith.constant 0 : index
      %c0_30 = arith.constant 0 : index
      %60 = vector.load %arg3[%c0_29, %c0_30] : memref<1x128xf32, #tpu.memory_space<vmem>>, vector<1x128xf32>
      tpu.vector_store %arg3[%c0_29, %c0_30], %59 {strides = array<i32>} : memref<1x128xf32, #tpu.memory_space<vmem>>, vector<1x128xf32>,
      %cst_31 = arith.constant dense<0xFF800000> : vector<1xf32>
      %61 = vector.multi_reduction <maximumf>, %59, %cst_31 [1] : vector<1x128xf32> to vector<1xf32>
      %62 = vector.shape_cast %61 : vector<1xf32> to vector<1x1xf32>
      %63 = vector.broadcast %62 : vector<1x1xf32> to vector<1x128xf32>
      %64 = arith.cmpf oeq, %59, %63 : vector<1x128xf32>
      %65 = vector.broadcast %cst_11 : f32 to vector<1x128xf32>
      %66 = arith.select %64, %3, %65 : vector<1x128xi1>, vector<1x128xf32>
      %cst_32 = arith.constant dense<0x7F800000> : vector<1xf32>
      %67 = vector.multi_reduction <minimumf>, %66, %cst_32 [1] : vector<1x128xf32> to vector<1xf32>
      %68 = vector.shape_cast %67 : vector<1xf32> to vector<1x1xf32>
      %69 = arith.fptosi %68 : vector<1x1xf32> to vector<1x1xi32>
      %c0_33 = arith.constant 0 : index
      %c0_34 = arith.constant 0 : index
      %70 = vector.load %arg4[%c0_33, %c0_34] : memref<1x1xi32, #tpu.memory_space<vmem>>, vector<1x1xi32>
      tpu.vector_store %arg4[%c0_33, %c0_34], %69 {strides = array<i32>} : memref<1x1xi32, #tpu.memory_space<vmem>>, vector<1x1xi32>,
    }
    %c8_i32_13 = arith.constant 8 : i32
    return
  }
  func.func @transform_0(%arg0: i32) -> (i32, i32, i32) {
    %c0_i32 = arith.constant 0 : i32
    %c0_i32_0 = arith.constant 0 : i32
    %c0_i32_1 = arith.constant 0 : i32
    return %arg0, %c0_i32, %c0_i32_0 : i32, i32, i32
  }
  func.func @transform_1(%arg0: i32) -> (i32, i32, i32) {
    %c0_i32 = arith.constant 0 : i32
    %c0_i32_0 = arith.constant 0 : i32
    %c0_i32_1 = arith.constant 0 : i32
    return %arg0, %c0_i32, %c0_i32_0 : i32, i32, i32
  }
}

module attributes {stable_mosaic.version = 11 : i64} {
  func.func @_knn_kernel(%arg0: i32, %arg1: i32, %arg2: i32, %arg3: memref<1x8x3xf32, #tpu.memory_space<vmem>>, %arg4: memref<1x3x128xf32, #tpu.memory_space<vmem>>, %arg5: memref<1x8x4xi32, #tpu.memory_space<vmem>>, %arg6: memref<8x4xf32, #tpu.memory_space<vmem>>, %arg7: memref<8x4xi32, #tpu.memory_space<vmem>>) attributes {dimension_semantics = [#tpu.dimension_semantics<parallel>, #tpu.dimension_semantics<parallel>, #tpu.dimension_semantics<arbitrary>], iteration_bounds = array<i64: 2, 1, 1>, scalar_prefetch = 0 : i64, scratch_operands = 2 : i64, tpu.core_type = #tpu.core_type<tc>, window_params = [{transform_indices = @transform_0, window_bounds = array<i64: 1, 8, 3>}, {transform_indices = @transform_1, window_bounds = array<i64: 1, 3, 128>}, {transform_indices = @transform_2, window_bounds = array<i64: 1, 8, 4>}]} {
    %c0_i32 = arith.constant 0 : i32
    %0 = arith.cmpi eq, %arg2, %c0_i32 : i32
    %1 = arith.extui %0 : i1 to i32
    %c0_i32_0 = arith.constant 0 : i32
    %2 = arith.cmpi ne, %1, %c0_i32_0 : i32
    scf.if %2 {
      %cst_65 = arith.constant 0x7F800000 : f32
      %240 = vector.broadcast %cst_65 : f32 to vector<8x4xf32>
      %c0_66 = arith.constant 0 : index
      %c0_67 = arith.constant 0 : index
      %241 = vector.load %arg6[%c0_66, %c0_67] : memref<8x4xf32, #tpu.memory_space<vmem>>, vector<8x4xf32>
      tpu.vector_store %arg6[%c0_66, %c0_67], %240 {strides = array<i32>} : memref<8x4xf32, #tpu.memory_space<vmem>>, vector<8x4xf32>,
      %c0_i32_68 = arith.constant 0 : i32
      %242 = vector.broadcast %c0_i32_68 : i32 to vector<8x4xi32>
      %c0_69 = arith.constant 0 : index
      %c0_70 = arith.constant 0 : index
      %243 = vector.load %arg7[%c0_69, %c0_70] : memref<8x4xi32, #tpu.memory_space<vmem>>, vector<8x4xi32>
      tpu.vector_store %arg7[%c0_69, %c0_70], %242 {strides = array<i32>} : memref<8x4xi32, #tpu.memory_space<vmem>>, vector<8x4xi32>,
    } else {
    }
    %c0 = arith.constant 0 : index
    %c0_1 = arith.constant 0 : index
    %c0_2 = arith.constant 0 : index
    %3 = vector.load %arg3[%c0, %c0_1, %c0_2] : memref<1x8x3xf32, #tpu.memory_space<vmem>>, vector<1x8x3xf32>
    %4 = vector.shape_cast %3 : vector<1x8x3xf32> to vector<8x3xf32>
    %c0_3 = arith.constant 0 : index
    %c0_4 = arith.constant 0 : index
    %c0_5 = arith.constant 0 : index
    %5 = vector.load %arg4[%c0_3, %c0_4, %c0_5] : memref<1x3x128xf32, #tpu.memory_space<vmem>>, vector<1x3x128xf32>
    %6 = vector.shape_cast %5 : vector<1x3x128xf32> to vector<3x128xf32>
    %cst = arith.constant 0.000000e+00 : f32
    %7 = vector.broadcast %cst : f32 to vector<8x128xf32>
    %8 = vector.extract_strided_slice %4 {offsets = [0, 0], sizes = [8, 1], strides = [1, 1]} : vector<8x3xf32> to vector<8x1xf32>
    %9 = vector.extract_strided_slice %6 {offsets = [0, 0], sizes = [1, 128], strides = [1, 1]} : vector<3x128xf32> to vector<1x128xf32>
    %10 = vector.broadcast %8 : vector<8x1xf32> to vector<8x128xf32>
    %11 = vector.broadcast %9 : vector<1x128xf32> to vector<8x128xf32>
    %12 = arith.subf %10, %11 : vector<8x128xf32>
    %13 = arith.mulf %12, %12 : vector<8x128xf32>
    %14 = arith.addf %7, %13 : vector<8x128xf32>
    %15 = vector.extract_strided_slice %4 {offsets = [0, 1], sizes = [8, 1], strides = [1, 1]} : vector<8x3xf32> to vector<8x1xf32>
    %16 = vector.extract_strided_slice %6 {offsets = [1, 0], sizes = [1, 128], strides = [1, 1]} : vector<3x128xf32> to vector<1x128xf32>
    %17 = vector.broadcast %15 : vector<8x1xf32> to vector<8x128xf32>
    %18 = vector.broadcast %16 : vector<1x128xf32> to vector<8x128xf32>
    %19 = arith.subf %17, %18 : vector<8x128xf32>
    %20 = arith.mulf %19, %19 : vector<8x128xf32>
    %21 = arith.addf %14, %20 : vector<8x128xf32>
    %22 = vector.extract_strided_slice %4 {offsets = [0, 2], sizes = [8, 1], strides = [1, 1]} : vector<8x3xf32> to vector<8x1xf32>
    %23 = vector.extract_strided_slice %6 {offsets = [2, 0], sizes = [1, 128], strides = [1, 1]} : vector<3x128xf32> to vector<1x128xf32>
    %24 = vector.broadcast %22 : vector<8x1xf32> to vector<8x128xf32>
    %25 = vector.broadcast %23 : vector<1x128xf32> to vector<8x128xf32>
    %26 = arith.subf %24, %25 : vector<8x128xf32>
    %27 = arith.mulf %26, %26 : vector<8x128xf32>
    %28 = arith.addf %21, %27 : vector<8x128xf32>
    %c128_i32 = arith.constant 128 : i32
    %29 = arith.muli %arg2, %c128_i32 : i32
    %30 = tpu.iota {dimensions = array<i32: 1>} : vector<8x128xi32>
    %31 = arith.sitofp %30 : vector<8x128xi32> to vector<8x128xf32>
    %32 = vector.broadcast %29 : i32 to vector<8x128xi32>
    %33 = arith.addi %30, %32 : vector<8x128xi32>
    %c16_i32 = arith.constant 16 : i32
    %34 = vector.broadcast %c16_i32 : i32 to vector<8x128xi32>
    %35 = arith.cmpi slt, %33, %34 : vector<8x128xi32>
    %cst_6 = arith.constant 0x7F800000 : f32
    %36 = vector.broadcast %cst_6 : f32 to vector<8x128xf32>
    %37 = arith.select %35, %28, %36 : vector<8x128xi1>, vector<8x128xf32>
    %c0_7 = arith.constant 0 : index
    %c0_8 = arith.constant 0 : index
    %38 = vector.load %arg6[%c0_7, %c0_8] : memref<8x4xf32, #tpu.memory_space<vmem>>, vector<8x4xf32>
    %c0_9 = arith.constant 0 : index
    %c0_10 = arith.constant 0 : index
    %39 = vector.load %arg7[%c0_9, %c0_10] : memref<8x4xi32, #tpu.memory_space<vmem>>, vector<8x4xi32>
    %40 = tpu.iota {dimensions = array<i32: 1>} : vector<8x4xi32>
    %41 = arith.sitofp %40 : vector<8x4xi32> to vector<8x4xf32>
    %cst_11 = arith.constant 0.000000e+00 : f32
    %42 = vector.broadcast %cst_11 : f32 to vector<8x4xf32>
    %c0_i32_12 = arith.constant 0 : i32
    %43 = vector.broadcast %c0_i32_12 : i32 to vector<8x4xi32>
    %cst_13 = arith.constant dense<0x7F800000> : vector<8xf32>
    %44 = vector.multi_reduction <minimumf>, %37, %cst_13 [1] : vector<8x128xf32> to vector<8xf32>
    %45 = vector.shape_cast %44 : vector<8xf32> to vector<8x1xf32>
    %cst_14 = arith.constant dense<0x7F800000> : vector<8xf32>
    %46 = vector.multi_reduction <minimumf>, %38, %cst_14 [1] : vector<8x4xf32> to vector<8xf32>
    %47 = vector.shape_cast %46 : vector<8xf32> to vector<8x1xf32>
    %48 = arith.cmpf olt, %45, %47 : vector<8x1xf32>
    %49 = arith.minimumf %45, %47 : vector<8x1xf32>
    %50 = vector.broadcast %45 : vector<8x1xf32> to vector<8x128xf32>
    %51 = arith.cmpf oeq, %37, %50 : vector<8x128xf32>
    %cst_15 = arith.constant 1.000000e+09 : f32
    %52 = vector.broadcast %cst_15 : f32 to vector<8x128xf32>
    %53 = arith.select %51, %31, %52 : vector<8x128xi1>, vector<8x128xf32>
    %cst_16 = arith.constant dense<0x7F800000> : vector<8xf32>
    %54 = vector.multi_reduction <minimumf>, %53, %cst_16 [1] : vector<8x128xf32> to vector<8xf32>
    %55 = vector.shape_cast %54 : vector<8xf32> to vector<8x1xf32>
    %56 = vector.broadcast %47 : vector<8x1xf32> to vector<8x4xf32>
    %57 = arith.cmpf oeq, %38, %56 : vector<8x4xf32>
    %cst_17 = arith.constant 1.000000e+09 : f32
    %58 = vector.broadcast %cst_17 : f32 to vector<8x4xf32>
    %59 = arith.select %57, %41, %58 : vector<8x4xi1>, vector<8x4xf32>
    %cst_18 = arith.constant dense<0x7F800000> : vector<8xf32>
    %60 = vector.multi_reduction <minimumf>, %59, %cst_18 [1] : vector<8x4xf32> to vector<8xf32>
    %61 = vector.shape_cast %60 : vector<8xf32> to vector<8x1xf32>
    %62 = arith.fptosi %55 : vector<8x1xf32> to vector<8x1xi32>
    %63 = vector.broadcast %29 : i32 to vector<8x1xi32>
    %64 = arith.addi %62, %63 : vector<8x1xi32>
    %65 = vector.broadcast %61 : vector<8x1xf32> to vector<8x4xf32>
    %66 = arith.cmpf oeq, %41, %65 : vector<8x4xf32>
    %c0_i32_19 = arith.constant 0 : i32
    %67 = vector.broadcast %c0_i32_19 : i32 to vector<8x4xi32>
    %68 = arith.select %66, %39, %67 : vector<8x4xi1>, vector<8x4xi32>
    %cst_20 = arith.constant dense<0> : vector<8xi32>
    %69 = vector.multi_reduction <add>, %68, %cst_20 [1] : vector<8x4xi32> to vector<8xi32>
    %70 = vector.shape_cast %69 : vector<8xi32> to vector<8x1xi32>
    %71 = arith.select %48, %64, %70 : vector<8x1xi1>, vector<8x1xi32>
    %c0_i32_21 = arith.constant 0 : i32
    %72 = vector.broadcast %c0_i32_21 : i32 to vector<8x4xi32>
    %73 = arith.cmpi eq, %40, %72 : vector<8x4xi32>
    %74 = vector.shape_cast %49 : vector<8x1xf32> to vector<8x1xf32>
    %75 = vector.broadcast %74 : vector<8x1xf32> to vector<8x4xf32>
    %76 = arith.select %73, %75, %42 : vector<8x4xi1>, vector<8x4xf32>
    %c0_i32_22 = arith.constant 0 : i32
    %77 = vector.broadcast %c0_i32_22 : i32 to vector<8x4xi32>
    %78 = arith.cmpi eq, %40, %77 : vector<8x4xi32>
    %79 = vector.shape_cast %71 : vector<8x1xi32> to vector<8x1xi32>
    %80 = vector.broadcast %79 : vector<8x1xi32> to vector<8x4xi32>
    %81 = arith.select %78, %80, %43 : vector<8x4xi1>, vector<8x4xi32>
    %82 = vector.broadcast %55 : vector<8x1xf32> to vector<8x128xf32>
    %83 = arith.cmpf oeq, %31, %82 : vector<8x128xf32>
    %84 = vector.broadcast %48 : vector<8x1xi1> to vector<8x128xi1>
    %85 = arith.andi %83, %84 : vector<8x128xi1>
    %cst_23 = arith.constant 0x7F800000 : f32
    %86 = vector.broadcast %cst_23 : f32 to vector<8x128xf32>
    %87 = arith.select %85, %86, %37 : vector<8x128xi1>, vector<8x128xf32>
    %88 = vector.broadcast %61 : vector<8x1xf32> to vector<8x4xf32>
    %89 = arith.cmpf oeq, %41, %88 : vector<8x4xf32>
    %cst_24 = arith.constant dense<true> : vector<8x1xi1>
    %90 = arith.xori %48, %cst_24 : vector<8x1xi1>
    %91 = vector.broadcast %90 : vector<8x1xi1> to vector<8x4xi1>
    %92 = arith.andi %89, %91 : vector<8x4xi1>
    %cst_25 = arith.constant 0x7F800000 : f32
    %93 = vector.broadcast %cst_25 : f32 to vector<8x4xf32>
    %94 = arith.select %92, %93, %38 : vector<8x4xi1>, vector<8x4xf32>
    %cst_26 = arith.constant dense<0x7F800000> : vector<8xf32>
    %95 = vector.multi_reduction <minimumf>, %87, %cst_26 [1] : vector<8x128xf32> to vector<8xf32>
    %96 = vector.shape_cast %95 : vector<8xf32> to vector<8x1xf32>
    %cst_27 = arith.constant dense<0x7F800000> : vector<8xf32>
    %97 = vector.multi_reduction <minimumf>, %94, %cst_27 [1] : vector<8x4xf32> to vector<8xf32>
    %98 = vector.shape_cast %97 : vector<8xf32> to vector<8x1xf32>
    %99 = arith.cmpf olt, %96, %98 : vector<8x1xf32>
    %100 = arith.minimumf %96, %98 : vector<8x1xf32>
    %101 = vector.broadcast %96 : vector<8x1xf32> to vector<8x128xf32>
    %102 = arith.cmpf oeq, %87, %101 : vector<8x128xf32>
    %cst_28 = arith.constant 1.000000e+09 : f32
    %103 = vector.broadcast %cst_28 : f32 to vector<8x128xf32>
    %104 = arith.select %102, %31, %103 : vector<8x128xi1>, vector<8x128xf32>
    %cst_29 = arith.constant dense<0x7F800000> : vector<8xf32>
    %105 = vector.multi_reduction <minimumf>, %104, %cst_29 [1] : vector<8x128xf32> to vector<8xf32>
    %106 = vector.shape_cast %105 : vector<8xf32> to vector<8x1xf32>
    %107 = vector.broadcast %98 : vector<8x1xf32> to vector<8x4xf32>
    %108 = arith.cmpf oeq, %94, %107 : vector<8x4xf32>
    %cst_30 = arith.constant 1.000000e+09 : f32
    %109 = vector.broadcast %cst_30 : f32 to vector<8x4xf32>
    %110 = arith.select %108, %41, %109 : vector<8x4xi1>, vector<8x4xf32>
    %cst_31 = arith.constant dense<0x7F800000> : vector<8xf32>
    %111 = vector.multi_reduction <minimumf>, %110, %cst_31 [1] : vector<8x4xf32> to vector<8xf32>
    %112 = vector.shape_cast %111 : vector<8xf32> to vector<8x1xf32>
    %113 = arith.fptosi %106 : vector<8x1xf32> to vector<8x1xi32>
    %114 = vector.broadcast %29 : i32 to vector<8x1xi32>
    %115 = arith.addi %113, %114 : vector<8x1xi32>
    %116 = vector.broadcast %112 : vector<8x1xf32> to vector<8x4xf32>
    %117 = arith.cmpf oeq, %41, %116 : vector<8x4xf32>
    %c0_i32_32 = arith.constant 0 : i32
    %118 = vector.broadcast %c0_i32_32 : i32 to vector<8x4xi32>
    %119 = arith.select %117, %39, %118 : vector<8x4xi1>, vector<8x4xi32>
    %cst_33 = arith.constant dense<0> : vector<8xi32>
    %120 = vector.multi_reduction <add>, %119, %cst_33 [1] : vector<8x4xi32> to vector<8xi32>
    %121 = vector.shape_cast %120 : vector<8xi32> to vector<8x1xi32>
    %122 = arith.select %99, %115, %121 : vector<8x1xi1>, vector<8x1xi32>
    %c1_i32 = arith.constant 1 : i32
    %123 = vector.broadcast %c1_i32 : i32 to vector<8x4xi32>
    %124 = arith.cmpi eq, %40, %123 : vector<8x4xi32>
    %125 = vector.shape_cast %100 : vector<8x1xf32> to vector<8x1xf32>
    %126 = vector.broadcast %125 : vector<8x1xf32> to vector<8x4xf32>
    %127 = arith.select %124, %126, %76 : vector<8x4xi1>, vector<8x4xf32>
    %c1_i32_34 = arith.constant 1 : i32
    %128 = vector.broadcast %c1_i32_34 : i32 to vector<8x4xi32>
    %129 = arith.cmpi eq, %40, %128 : vector<8x4xi32>
    %130 = vector.shape_cast %122 : vector<8x1xi32> to vector<8x1xi32>
    %131 = vector.broadcast %130 : vector<8x1xi32> to vector<8x4xi32>
    %132 = arith.select %129, %131, %81 : vector<8x4xi1>, vector<8x4xi32>
    %133 = vector.broadcast %106 : vector<8x1xf32> to vector<8x128xf32>
    %134 = arith.cmpf oeq, %31, %133 : vector<8x128xf32>
    %135 = vector.broadcast %99 : vector<8x1xi1> to vector<8x128xi1>
    %136 = arith.andi %134, %135 : vector<8x128xi1>
    %cst_35 = arith.constant 0x7F800000 : f32
    %137 = vector.broadcast %cst_35 : f32 to vector<8x128xf32>
    %138 = arith.select %136, %137, %87 : vector<8x128xi1>, vector<8x128xf32>
    %139 = vector.broadcast %112 : vector<8x1xf32> to vector<8x4xf32>
    %140 = arith.cmpf oeq, %41, %139 : vector<8x4xf32>
    %cst_36 = arith.constant dense<true> : vector<8x1xi1>
    %141 = arith.xori %99, %cst_36 : vector<8x1xi1>
    %142 = vector.broadcast %141 : vector<8x1xi1> to vector<8x4xi1>
    %143 = arith.andi %140, %142 : vector<8x4xi1>
    %cst_37 = arith.constant 0x7F800000 : f32
    %144 = vector.broadcast %cst_37 : f32 to vector<8x4xf32>
    %145 = arith.select %143, %144, %94 : vector<8x4xi1>, vector<8x4xf32>
    %cst_38 = arith.constant dense<0x7F800000> : vector<8xf32>
    %146 = vector.multi_reduction <minimumf>, %138, %cst_38 [1] : vector<8x128xf32> to vector<8xf32>
    %147 = vector.shape_cast %146 : vector<8xf32> to vector<8x1xf32>
    %cst_39 = arith.constant dense<0x7F800000> : vector<8xf32>
    %148 = vector.multi_reduction <minimumf>, %145, %cst_39 [1] : vector<8x4xf32> to vector<8xf32>
    %149 = vector.shape_cast %148 : vector<8xf32> to vector<8x1xf32>
    %150 = arith.cmpf olt, %147, %149 : vector<8x1xf32>
    %151 = arith.minimumf %147, %149 : vector<8x1xf32>
    %152 = vector.broadcast %147 : vector<8x1xf32> to vector<8x128xf32>
    %153 = arith.cmpf oeq, %138, %152 : vector<8x128xf32>
    %cst_40 = arith.constant 1.000000e+09 : f32
    %154 = vector.broadcast %cst_40 : f32 to vector<8x128xf32>
    %155 = arith.select %153, %31, %154 : vector<8x128xi1>, vector<8x128xf32>
    %cst_41 = arith.constant dense<0x7F800000> : vector<8xf32>
    %156 = vector.multi_reduction <minimumf>, %155, %cst_41 [1] : vector<8x128xf32> to vector<8xf32>
    %157 = vector.shape_cast %156 : vector<8xf32> to vector<8x1xf32>
    %158 = vector.broadcast %149 : vector<8x1xf32> to vector<8x4xf32>
    %159 = arith.cmpf oeq, %145, %158 : vector<8x4xf32>
    %cst_42 = arith.constant 1.000000e+09 : f32
    %160 = vector.broadcast %cst_42 : f32 to vector<8x4xf32>
    %161 = arith.select %159, %41, %160 : vector<8x4xi1>, vector<8x4xf32>
    %cst_43 = arith.constant dense<0x7F800000> : vector<8xf32>
    %162 = vector.multi_reduction <minimumf>, %161, %cst_43 [1] : vector<8x4xf32> to vector<8xf32>
    %163 = vector.shape_cast %162 : vector<8xf32> to vector<8x1xf32>
    %164 = arith.fptosi %157 : vector<8x1xf32> to vector<8x1xi32>
    %165 = vector.broadcast %29 : i32 to vector<8x1xi32>
    %166 = arith.addi %164, %165 : vector<8x1xi32>
    %167 = vector.broadcast %163 : vector<8x1xf32> to vector<8x4xf32>
    %168 = arith.cmpf oeq, %41, %167 : vector<8x4xf32>
    %c0_i32_44 = arith.constant 0 : i32
    %169 = vector.broadcast %c0_i32_44 : i32 to vector<8x4xi32>
    %170 = arith.select %168, %39, %169 : vector<8x4xi1>, vector<8x4xi32>
    %cst_45 = arith.constant dense<0> : vector<8xi32>
    %171 = vector.multi_reduction <add>, %170, %cst_45 [1] : vector<8x4xi32> to vector<8xi32>
    %172 = vector.shape_cast %171 : vector<8xi32> to vector<8x1xi32>
    %173 = arith.select %150, %166, %172 : vector<8x1xi1>, vector<8x1xi32>
    %c2_i32 = arith.constant 2 : i32
    %174 = vector.broadcast %c2_i32 : i32 to vector<8x4xi32>
    %175 = arith.cmpi eq, %40, %174 : vector<8x4xi32>
    %176 = vector.shape_cast %151 : vector<8x1xf32> to vector<8x1xf32>
    %177 = vector.broadcast %176 : vector<8x1xf32> to vector<8x4xf32>
    %178 = arith.select %175, %177, %127 : vector<8x4xi1>, vector<8x4xf32>
    %c2_i32_46 = arith.constant 2 : i32
    %179 = vector.broadcast %c2_i32_46 : i32 to vector<8x4xi32>
    %180 = arith.cmpi eq, %40, %179 : vector<8x4xi32>
    %181 = vector.shape_cast %173 : vector<8x1xi32> to vector<8x1xi32>
    %182 = vector.broadcast %181 : vector<8x1xi32> to vector<8x4xi32>
    %183 = arith.select %180, %182, %132 : vector<8x4xi1>, vector<8x4xi32>
    %184 = vector.broadcast %157 : vector<8x1xf32> to vector<8x128xf32>
    %185 = arith.cmpf oeq, %31, %184 : vector<8x128xf32>
    %186 = vector.broadcast %150 : vector<8x1xi1> to vector<8x128xi1>
    %187 = arith.andi %185, %186 : vector<8x128xi1>
    %cst_47 = arith.constant 0x7F800000 : f32
    %188 = vector.broadcast %cst_47 : f32 to vector<8x128xf32>
    %189 = arith.select %187, %188, %138 : vector<8x128xi1>, vector<8x128xf32>
    %190 = vector.broadcast %163 : vector<8x1xf32> to vector<8x4xf32>
    %191 = arith.cmpf oeq, %41, %190 : vector<8x4xf32>
    %cst_48 = arith.constant dense<true> : vector<8x1xi1>
    %192 = arith.xori %150, %cst_48 : vector<8x1xi1>
    %193 = vector.broadcast %192 : vector<8x1xi1> to vector<8x4xi1>
    %194 = arith.andi %191, %193 : vector<8x4xi1>
    %cst_49 = arith.constant 0x7F800000 : f32
    %195 = vector.broadcast %cst_49 : f32 to vector<8x4xf32>
    %196 = arith.select %194, %195, %145 : vector<8x4xi1>, vector<8x4xf32>
    %cst_50 = arith.constant dense<0x7F800000> : vector<8xf32>
    %197 = vector.multi_reduction <minimumf>, %189, %cst_50 [1] : vector<8x128xf32> to vector<8xf32>
    %198 = vector.shape_cast %197 : vector<8xf32> to vector<8x1xf32>
    %cst_51 = arith.constant dense<0x7F800000> : vector<8xf32>
    %199 = vector.multi_reduction <minimumf>, %196, %cst_51 [1] : vector<8x4xf32> to vector<8xf32>
    %200 = vector.shape_cast %199 : vector<8xf32> to vector<8x1xf32>
    %201 = arith.cmpf olt, %198, %200 : vector<8x1xf32>
    %202 = arith.minimumf %198, %200 : vector<8x1xf32>
    %203 = vector.broadcast %198 : vector<8x1xf32> to vector<8x128xf32>
    %204 = arith.cmpf oeq, %189, %203 : vector<8x128xf32>
    %cst_52 = arith.constant 1.000000e+09 : f32
    %205 = vector.broadcast %cst_52 : f32 to vector<8x128xf32>
    %206 = arith.select %204, %31, %205 : vector<8x128xi1>, vector<8x128xf32>
    %cst_53 = arith.constant dense<0x7F800000> : vector<8xf32>
    %207 = vector.multi_reduction <minimumf>, %206, %cst_53 [1] : vector<8x128xf32> to vector<8xf32>
    %208 = vector.shape_cast %207 : vector<8xf32> to vector<8x1xf32>
    %209 = vector.broadcast %200 : vector<8x1xf32> to vector<8x4xf32>
    %210 = arith.cmpf oeq, %196, %209 : vector<8x4xf32>
    %cst_54 = arith.constant 1.000000e+09 : f32
    %211 = vector.broadcast %cst_54 : f32 to vector<8x4xf32>
    %212 = arith.select %210, %41, %211 : vector<8x4xi1>, vector<8x4xf32>
    %cst_55 = arith.constant dense<0x7F800000> : vector<8xf32>
    %213 = vector.multi_reduction <minimumf>, %212, %cst_55 [1] : vector<8x4xf32> to vector<8xf32>
    %214 = vector.shape_cast %213 : vector<8xf32> to vector<8x1xf32>
    %215 = arith.fptosi %208 : vector<8x1xf32> to vector<8x1xi32>
    %216 = vector.broadcast %29 : i32 to vector<8x1xi32>
    %217 = arith.addi %215, %216 : vector<8x1xi32>
    %218 = vector.broadcast %214 : vector<8x1xf32> to vector<8x4xf32>
    %219 = arith.cmpf oeq, %41, %218 : vector<8x4xf32>
    %c0_i32_56 = arith.constant 0 : i32
    %220 = vector.broadcast %c0_i32_56 : i32 to vector<8x4xi32>
    %221 = arith.select %219, %39, %220 : vector<8x4xi1>, vector<8x4xi32>
    %cst_57 = arith.constant dense<0> : vector<8xi32>
    %222 = vector.multi_reduction <add>, %221, %cst_57 [1] : vector<8x4xi32> to vector<8xi32>
    %223 = vector.shape_cast %222 : vector<8xi32> to vector<8x1xi32>
    %224 = arith.select %201, %217, %223 : vector<8x1xi1>, vector<8x1xi32>
    %c3_i32 = arith.constant 3 : i32
    %225 = vector.broadcast %c3_i32 : i32 to vector<8x4xi32>
    %226 = arith.cmpi eq, %40, %225 : vector<8x4xi32>
    %227 = vector.shape_cast %202 : vector<8x1xf32> to vector<8x1xf32>
    %228 = vector.broadcast %227 : vector<8x1xf32> to vector<8x4xf32>
    %229 = arith.select %226, %228, %178 : vector<8x4xi1>, vector<8x4xf32>
    %c3_i32_58 = arith.constant 3 : i32
    %230 = vector.broadcast %c3_i32_58 : i32 to vector<8x4xi32>
    %231 = arith.cmpi eq, %40, %230 : vector<8x4xi32>
    %232 = vector.shape_cast %224 : vector<8x1xi32> to vector<8x1xi32>
    %233 = vector.broadcast %232 : vector<8x1xi32> to vector<8x4xi32>
    %234 = arith.select %231, %233, %183 : vector<8x4xi1>, vector<8x4xi32>
    %c0_59 = arith.constant 0 : index
    %c0_60 = arith.constant 0 : index
    %235 = vector.load %arg6[%c0_59, %c0_60] : memref<8x4xf32, #tpu.memory_space<vmem>>, vector<8x4xf32>
    tpu.vector_store %arg6[%c0_59, %c0_60], %229 {strides = array<i32>} : memref<8x4xf32, #tpu.memory_space<vmem>>, vector<8x4xf32>,
    %c0_61 = arith.constant 0 : index
    %c0_62 = arith.constant 0 : index
    %236 = vector.load %arg7[%c0_61, %c0_62] : memref<8x4xi32, #tpu.memory_space<vmem>>, vector<8x4xi32>
    tpu.vector_store %arg7[%c0_61, %c0_62], %234 {strides = array<i32>} : memref<8x4xi32, #tpu.memory_space<vmem>>, vector<8x4xi32>,
    %c0_i32_63 = arith.constant 0 : i32
    %237 = arith.cmpi eq, %arg2, %c0_i32_63 : i32
    %238 = arith.extui %237 : i1 to i32
    %c0_i32_64 = arith.constant 0 : i32
    %239 = arith.cmpi ne, %238, %c0_i32_64 : i32
    scf.if %239 {
      %c0_65 = arith.constant 0 : index
      %c0_66 = arith.constant 0 : index
      %240 = vector.load %arg7[%c0_65, %c0_66] : memref<8x4xi32, #tpu.memory_space<vmem>>, vector<8x4xi32>
      %c0_67 = arith.constant 0 : index
      %c0_68 = arith.constant 0 : index
      %c0_69 = arith.constant 0 : index
      %241 = vector.load %arg5[%c0_67, %c0_68, %c0_69] : memref<1x8x4xi32, #tpu.memory_space<vmem>>, vector<1x8x4xi32>
      %242 = vector.shape_cast %241 : vector<1x8x4xi32> to vector<8x4xi32>
      %243 = vector.shape_cast %240 : vector<8x4xi32> to vector<1x8x4xi32>
      tpu.vector_store %arg5[%c0_67, %c0_68, %c0_69], %243 {strides = array<i32>} : memref<1x8x4xi32, #tpu.memory_space<vmem>>, vector<1x8x4xi32>,
    } else {
    }
    return
  }
  func.func @transform_0(%arg0: i32, %arg1: i32, %arg2: i32) -> (i32, i32, i32) {
    %c0_i32 = arith.constant 0 : i32
    %c0_i32_0 = arith.constant 0 : i32
    return %arg0, %arg1, %c0_i32 : i32, i32, i32
  }
  func.func @transform_1(%arg0: i32, %arg1: i32, %arg2: i32) -> (i32, i32, i32) {
    %c0_i32 = arith.constant 0 : i32
    %c0_i32_0 = arith.constant 0 : i32
    return %arg0, %c0_i32, %arg2 : i32, i32, i32
  }
  func.func @transform_2(%arg0: i32, %arg1: i32, %arg2: i32) -> (i32, i32, i32) {
    %c0_i32 = arith.constant 0 : i32
    %c0_i32_0 = arith.constant 0 : i32
    return %arg0, %arg1, %c0_i32 : i32, i32, i32
  }
}

module attributes {stable_mosaic.version = 11 : i64} {
  func.func @_sa_mlp_kernel(%arg0: i32, %arg1: i32, %arg2: memref<1x4x8x16xbf16, #tpu.memory_space<vmem>>, %arg3: memref<16x128xbf16, #tpu.memory_space<vmem>>, %arg4: memref<1x128xf32, #tpu.memory_space<vmem>>, %arg5: memref<128x128xbf16, #tpu.memory_space<vmem>>, %arg6: memref<1x128xf32, #tpu.memory_space<vmem>>, %arg7: memref<1x8x128xf32, #tpu.memory_space<vmem>>) attributes {dimension_semantics = [#tpu.dimension_semantics<parallel>, #tpu.dimension_semantics<parallel>], iteration_bounds = array<i64: 2, 1>, scalar_prefetch = 0 : i64, scratch_operands = 0 : i64, tpu.core_type = #tpu.core_type<tc>, window_params = [{transform_indices = @transform_0, window_bounds = array<i64: 1, 4, 8, 16>}, {pipeline_mode = #tpu.pipeline_mode<synchronous>, transform_indices = @transform_1, window_bounds = array<i64: 16, 128>}, {pipeline_mode = #tpu.pipeline_mode<synchronous>, transform_indices = @transform_2, window_bounds = array<i64: 1, 128>}, {pipeline_mode = #tpu.pipeline_mode<synchronous>, transform_indices = @transform_3, window_bounds = array<i64: 128, 128>}, {pipeline_mode = #tpu.pipeline_mode<synchronous>, transform_indices = @transform_4, window_bounds = array<i64: 1, 128>}, {transform_indices = @transform_5, window_bounds = array<i64: 1, 8, 128>}]} {
    %c0 = arith.constant 0 : index
    %c0_0 = arith.constant 0 : index
    %0 = vector.load %arg3[%c0, %c0_0] : memref<16x128xbf16, #tpu.memory_space<vmem>>, vector<16x128xbf16>
    %c0_1 = arith.constant 0 : index
    %c0_2 = arith.constant 0 : index
    %1 = vector.load %arg4[%c0_1, %c0_2] : memref<1x128xf32, #tpu.memory_space<vmem>>, vector<1x128xf32>
    %c0_3 = arith.constant 0 : index
    %c0_4 = arith.constant 0 : index
    %2 = vector.load %arg5[%c0_3, %c0_4] : memref<128x128xbf16, #tpu.memory_space<vmem>>, vector<128x128xbf16>
    %c0_5 = arith.constant 0 : index
    %c0_6 = arith.constant 0 : index
    %3 = vector.load %arg6[%c0_5, %c0_6] : memref<1x128xf32, #tpu.memory_space<vmem>>, vector<1x128xf32>
    %c0_7 = arith.constant 0 : index
    %c0_8 = arith.constant 0 : index
    %c0_9 = arith.constant 0 : index
    %c0_10 = arith.constant 0 : index
    %4 = vector.load %arg2[%c0_7, %c0_8, %c0_9, %c0_10] : memref<1x4x8x16xbf16, #tpu.memory_space<vmem>>, vector<1x1x8x16xbf16>
    %5 = vector.shape_cast %4 : vector<1x1x8x16xbf16> to vector<8x16xbf16>
    %cst = arith.constant dense<0.000000e+00> : vector<8x128xf32>
    %6 = tpu.matmul %5, %0, %cst {dimension_numbers = #tpu.dot_dimension_numbers<[1], [0], [0], [1], [0, 0, 1, 1], [], []>} : vector<8x16xbf16>, vector<16x128xbf16>, vector<8x128xf32> -> vector<8x128xf32>
    %7 = vector.broadcast %1 : vector<1x128xf32> to vector<8x128xf32>
    %8 = arith.addf %6, %7 : vector<8x128xf32>
    %cst_11 = arith.constant 0.000000e+00 : f32
    %9 = vector.broadcast %cst_11 : f32 to vector<8x128xf32>
    %10 = arith.maximumf %8, %9 : vector<8x128xf32>
    %11 = arith.truncf %10 : vector<8x128xf32> to vector<8x128xbf16>
    %cst_12 = arith.constant dense<0.000000e+00> : vector<8x128xf32>
    %12 = tpu.matmul %11, %2, %cst_12 {dimension_numbers = #tpu.dot_dimension_numbers<[1], [0], [0], [1], [0, 0, 1, 1], [], []>} : vector<8x128xbf16>, vector<128x128xbf16>, vector<8x128xf32> -> vector<8x128xf32>
    %13 = vector.broadcast %3 : vector<1x128xf32> to vector<8x128xf32>
    %14 = arith.addf %12, %13 : vector<8x128xf32>
    %cst_13 = arith.constant 0.000000e+00 : f32
    %15 = vector.broadcast %cst_13 : f32 to vector<8x128xf32>
    %16 = arith.maximumf %14, %15 : vector<8x128xf32>
    %c0_14 = arith.constant 0 : index
    %c1 = arith.constant 1 : index
    %c0_15 = arith.constant 0 : index
    %c0_16 = arith.constant 0 : index
    %17 = vector.load %arg2[%c0_14, %c1, %c0_15, %c0_16] : memref<1x4x8x16xbf16, #tpu.memory_space<vmem>>, vector<1x1x8x16xbf16>
    %18 = vector.shape_cast %17 : vector<1x1x8x16xbf16> to vector<8x16xbf16>
    %cst_17 = arith.constant dense<0.000000e+00> : vector<8x128xf32>
    %19 = tpu.matmul %18, %0, %cst_17 {dimension_numbers = #tpu.dot_dimension_numbers<[1], [0], [0], [1], [0, 0, 1, 1], [], []>} : vector<8x16xbf16>, vector<16x128xbf16>, vector<8x128xf32> -> vector<8x128xf32>
    %20 = vector.broadcast %1 : vector<1x128xf32> to vector<8x128xf32>
    %21 = arith.addf %19, %20 : vector<8x128xf32>
    %cst_18 = arith.constant 0.000000e+00 : f32
    %22 = vector.broadcast %cst_18 : f32 to vector<8x128xf32>
    %23 = arith.maximumf %21, %22 : vector<8x128xf32>
    %24 = arith.truncf %23 : vector<8x128xf32> to vector<8x128xbf16>
    %cst_19 = arith.constant dense<0.000000e+00> : vector<8x128xf32>
    %25 = tpu.matmul %24, %2, %cst_19 {dimension_numbers = #tpu.dot_dimension_numbers<[1], [0], [0], [1], [0, 0, 1, 1], [], []>} : vector<8x128xbf16>, vector<128x128xbf16>, vector<8x128xf32> -> vector<8x128xf32>
    %26 = vector.broadcast %3 : vector<1x128xf32> to vector<8x128xf32>
    %27 = arith.addf %25, %26 : vector<8x128xf32>
    %cst_20 = arith.constant 0.000000e+00 : f32
    %28 = vector.broadcast %cst_20 : f32 to vector<8x128xf32>
    %29 = arith.maximumf %27, %28 : vector<8x128xf32>
    %30 = arith.maximumf %16, %29 : vector<8x128xf32>
    %c0_21 = arith.constant 0 : index
    %c2 = arith.constant 2 : index
    %c0_22 = arith.constant 0 : index
    %c0_23 = arith.constant 0 : index
    %31 = vector.load %arg2[%c0_21, %c2, %c0_22, %c0_23] : memref<1x4x8x16xbf16, #tpu.memory_space<vmem>>, vector<1x1x8x16xbf16>
    %32 = vector.shape_cast %31 : vector<1x1x8x16xbf16> to vector<8x16xbf16>
    %cst_24 = arith.constant dense<0.000000e+00> : vector<8x128xf32>
    %33 = tpu.matmul %32, %0, %cst_24 {dimension_numbers = #tpu.dot_dimension_numbers<[1], [0], [0], [1], [0, 0, 1, 1], [], []>} : vector<8x16xbf16>, vector<16x128xbf16>, vector<8x128xf32> -> vector<8x128xf32>
    %34 = vector.broadcast %1 : vector<1x128xf32> to vector<8x128xf32>
    %35 = arith.addf %33, %34 : vector<8x128xf32>
    %cst_25 = arith.constant 0.000000e+00 : f32
    %36 = vector.broadcast %cst_25 : f32 to vector<8x128xf32>
    %37 = arith.maximumf %35, %36 : vector<8x128xf32>
    %38 = arith.truncf %37 : vector<8x128xf32> to vector<8x128xbf16>
    %cst_26 = arith.constant dense<0.000000e+00> : vector<8x128xf32>
    %39 = tpu.matmul %38, %2, %cst_26 {dimension_numbers = #tpu.dot_dimension_numbers<[1], [0], [0], [1], [0, 0, 1, 1], [], []>} : vector<8x128xbf16>, vector<128x128xbf16>, vector<8x128xf32> -> vector<8x128xf32>
    %40 = vector.broadcast %3 : vector<1x128xf32> to vector<8x128xf32>
    %41 = arith.addf %39, %40 : vector<8x128xf32>
    %cst_27 = arith.constant 0.000000e+00 : f32
    %42 = vector.broadcast %cst_27 : f32 to vector<8x128xf32>
    %43 = arith.maximumf %41, %42 : vector<8x128xf32>
    %44 = arith.maximumf %30, %43 : vector<8x128xf32>
    %c0_28 = arith.constant 0 : index
    %c3 = arith.constant 3 : index
    %c0_29 = arith.constant 0 : index
    %c0_30 = arith.constant 0 : index
    %45 = vector.load %arg2[%c0_28, %c3, %c0_29, %c0_30] : memref<1x4x8x16xbf16, #tpu.memory_space<vmem>>, vector<1x1x8x16xbf16>
    %46 = vector.shape_cast %45 : vector<1x1x8x16xbf16> to vector<8x16xbf16>
    %cst_31 = arith.constant dense<0.000000e+00> : vector<8x128xf32>
    %47 = tpu.matmul %46, %0, %cst_31 {dimension_numbers = #tpu.dot_dimension_numbers<[1], [0], [0], [1], [0, 0, 1, 1], [], []>} : vector<8x16xbf16>, vector<16x128xbf16>, vector<8x128xf32> -> vector<8x128xf32>
    %48 = vector.broadcast %1 : vector<1x128xf32> to vector<8x128xf32>
    %49 = arith.addf %47, %48 : vector<8x128xf32>
    %cst_32 = arith.constant 0.000000e+00 : f32
    %50 = vector.broadcast %cst_32 : f32 to vector<8x128xf32>
    %51 = arith.maximumf %49, %50 : vector<8x128xf32>
    %52 = arith.truncf %51 : vector<8x128xf32> to vector<8x128xbf16>
    %cst_33 = arith.constant dense<0.000000e+00> : vector<8x128xf32>
    %53 = tpu.matmul %52, %2, %cst_33 {dimension_numbers = #tpu.dot_dimension_numbers<[1], [0], [0], [1], [0, 0, 1, 1], [], []>} : vector<8x128xbf16>, vector<128x128xbf16>, vector<8x128xf32> -> vector<8x128xf32>
    %54 = vector.broadcast %3 : vector<1x128xf32> to vector<8x128xf32>
    %55 = arith.addf %53, %54 : vector<8x128xf32>
    %cst_34 = arith.constant 0.000000e+00 : f32
    %56 = vector.broadcast %cst_34 : f32 to vector<8x128xf32>
    %57 = arith.maximumf %55, %56 : vector<8x128xf32>
    %58 = arith.maximumf %44, %57 : vector<8x128xf32>
    %c0_35 = arith.constant 0 : index
    %c0_36 = arith.constant 0 : index
    %c0_37 = arith.constant 0 : index
    %59 = vector.load %arg7[%c0_35, %c0_36, %c0_37] : memref<1x8x128xf32, #tpu.memory_space<vmem>>, vector<1x8x128xf32>
    %60 = vector.shape_cast %59 : vector<1x8x128xf32> to vector<8x128xf32>
    %61 = vector.shape_cast %58 : vector<8x128xf32> to vector<1x8x128xf32>
    tpu.vector_store %arg7[%c0_35, %c0_36, %c0_37], %61 {strides = array<i32>} : memref<1x8x128xf32, #tpu.memory_space<vmem>>, vector<1x8x128xf32>,
    return
  }
  func.func @transform_0(%arg0: i32, %arg1: i32) -> (i32, i32, i32, i32) {
    %c0_i32 = arith.constant 0 : i32
    %c0_i32_0 = arith.constant 0 : i32
    %c0_i32_1 = arith.constant 0 : i32
    return %arg0, %c0_i32, %arg1, %c0_i32_0 : i32, i32, i32, i32
  }
  func.func @transform_1(%arg0: i32, %arg1: i32) -> (i32, i32) {
    %c0_i32 = arith.constant 0 : i32
    %c0_i32_0 = arith.constant 0 : i32
    %c0_i32_1 = arith.constant 0 : i32
    return %c0_i32, %c0_i32_0 : i32, i32
  }
  func.func @transform_2(%arg0: i32, %arg1: i32) -> (i32, i32) {
    %c0_i32 = arith.constant 0 : i32
    %c0_i32_0 = arith.constant 0 : i32
    %c0_i32_1 = arith.constant 0 : i32
    return %c0_i32, %c0_i32_0 : i32, i32
  }
  func.func @transform_3(%arg0: i32, %arg1: i32) -> (i32, i32) {
    %c0_i32 = arith.constant 0 : i32
    %c0_i32_0 = arith.constant 0 : i32
    %c0_i32_1 = arith.constant 0 : i32
    return %c0_i32, %c0_i32_0 : i32, i32
  }
  func.func @transform_4(%arg0: i32, %arg1: i32) -> (i32, i32) {
    %c0_i32 = arith.constant 0 : i32
    %c0_i32_0 = arith.constant 0 : i32
    %c0_i32_1 = arith.constant 0 : i32
    return %c0_i32, %c0_i32_0 : i32, i32
  }
  func.func @transform_5(%arg0: i32, %arg1: i32) -> (i32, i32, i32) {
    %c0_i32 = arith.constant 0 : i32
    %c0_i32_0 = arith.constant 0 : i32
    return %arg0, %arg1, %c0_i32 : i32, i32, i32
  }
}

</mosaic_0001>

<bundles_post_ra>
// kernel: transition_down.3
= control target key start
LH: loop header
LB: loop body
LE: loop exit
PB: predicated region body
PF: predicated region fallthrough
CT: control target
= control target key end

     0   :  { %s283_s6 = smov 0   ;;  %s320_s0 = inlined_call_operand.vmem [shape: f32[2,3,128], index: 0, kind: input, shape index: {}]   ;;  %s321_s1 = inlined_call_operand.vmem [shape: s32[2,1,8], index: 1, kind: output, shape index: {}]  }
   0x1 LB: > { %s224_s7 = sadd.s32 4294967295, %s264_s6   ;;  %p228_p0 = scmp.ge.s32.totalorder %s264_s6, 1  ;;  %s264_s6 = sphi %s283_s6, %s11_s6  }
   0x2   : > { %p86_p1 = scmp.lt.s32.totalorder %s264_s6, 3 }
   0x4   : > { %p87_p2 = pnand %p228_p0, %p86_p1 }
   0x5   : > { %v111_v0 = vlaneseq (!%p87_p2)  ;;  %vm117_vm0 = vcmask (!%p87_p2), 0   ;;  %p103_p3 = scmp.lt.s32.totalorder (!%p87_p2), %s224_s7, 1  ;;  %v270_v1 = vmov (!%p87_p2), 0   ;;  %vm119_vm1 = vcmask (!%p87_p2), 57344   ;;  %s303_s15 = smov (!%p87_p2), 0  }
   0x6   : > { %90 = sbr.rel (%p87_p2) target bundleno = 599 (0x257), region = 24  ;;  %118 = vst.msk [vmem:[#allocation3] sm:$0x1] (!%p87_p2), %vm117_vm0, %v270_v1  ;;  %v271_v4 = vmov (!%p87_p2), -1.0  }
   0x7   : > { %v112_v2 = vand.u32 (!%p87_p2), 127, %v111_v0 }
   0x9   : > { %v113_v3 = vcvt.s32.f32 (!%p87_p2), %v112_v2  ;;  %vm114_vm2 = vcmp.lt.s32.totalorder (!%p87_p2), %v112_v2, 16 }
   0xa   : > { %v115_v5 = vsel (!%p87_p2), %vm114_vm2, 1e+10, %v271_v4 }
   0xb   : > { %116 = vst [vmem:[#allocation2] sm:$0x1] (!%p87_p2), %v115_v5 }
   0xd   : > { %s323_s7 = smov (!%p103_p3, %s224_s7), 1 }
   0xe   : > { %s229_s8 = sshll.u32 %s323_s7, 2  ;;  %s296_s11 = scalar_lea.vmem %s321_s1, %s323_s7 }
   0xf   : > { %s106_s14 = scalar_lea.vmem %s320_s0, %s229_s8  ;;  %120 = vst.msk [vmem:[%s296_s11] sm:$0x1] %vm119_vm1, %v270_v1 }
  0x10   : > { %v110_v6 = vld [vmem:[%s106_s14] sm:$0x7] }
  0x11 LB: >> { %v127_v7 = vld [vmem:[#allocation3] sm:$0x1]  ;;  %v272_v8 = vmov 0   ;;  %v135_v9 = vshrl.u32 %v111_v0, 7  ;;  %v128_v11 = vstv %s268_s15  ;;  %vm144_vm4 = vcmask 1042432   ;;  %s126_s15 = sadd.s32 1, %s268_s15   ;;  %s268_s15 = sphi %s303_s15, %s126_s15  }
  0x12   : >> { %253 = vset.pattern.permute.xlu0 %v272_v8  ;;  %vm129_vm3 = vcmp.eq.s32.totalorder %v112_v2, %v128_v11  ;;  %v158_v24 = vld [vmem:[#allocation2] sm:$0x1]  ;;  %vm161_vm6 = vcmask 1040384   ;;  %p123_p4 = scmp.ge.s32.totalorder %s126_s15, 8  }
  0x13   : >> { %132 = vperm.xlu0 %253, %v127_v7   ;;  %v136_v10 = vsub.s32 0, %v135_v9 }
  0x16   : >> { %v130_v12 = vld [vmem:[%s296_s11] sm:$0x1] }
  0x92   : >> { %v133_v13 = vpop.permute.xlu0 %132 }
  0x93   : >> { %v137_v14 = vrot.slane %v133_v13, %v136_v10 }
  0x95   : >> { %v138_v15 = vsel %vm129_vm3, %v137_v14, %v130_v12  ;;  %vm140_vm5 = vcmp.eq.s32.totalorder %v112_v2, %v137_v14 }
  0x96   : >> { %139 = vst.msk [vmem:[%s296_s11] sm:$0x1] %vm119_vm1, %v138_v15  ;;  %v143_v16 = vsel %vm140_vm5, %v110_v6, 0.0 }
  0x97   : >> { %v145_v17 = vsel %vm144_vm4, %v143_v16, 0.0 }
  0x98   : >> { %146 = vadd.xlane.f32.xlu0 %v145_v17 }
 0x125   : >> { %v147_v18 = vpop.xlane.xlu0 %146 }
 0x126   : >> { %v148_v19 = vsub.f32 %v110_v6, %v147_v18 }
 0x128   : >> { %v149_v20 = vmul.f32 %v148_v19, %v148_v19 }
 0x12a   : >> { %v152_v21 = vrot.slane %v149_v20, 1  ;;  %v155_v23 = vrot.slane %v149_v20, 2 }
 0x12c   : >> { %v154_v22 = vadd.f32 %v152_v21, %v149_v20 }
 0x12e   : >> { %v157_v25 = vadd.f32 %v155_v23, %v154_v22 }
 0x130   : >> { %v159_v26 = vmin.f32 %v158_v24, %v157_v25 }
 0x132   : >> { %v162_v27 = vsel %vm161_vm6, %v159_v26, -inf  ;;  %160 = vst [vmem:[#allocation2] sm:$0x1] %v159_v26 }
 0x133   : >> { %163 = vmax.xlane.f32.xlu1 %v162_v27 }
 0x1c0   : >> { %v164_v28 = vpop.xlane.xlu1 %163 }
 0x1c1   : >> { %vm165_vm7 = vcmp.eq.f32.partialorder %v159_v26, %v164_v28 }
 0x1c2   : >> { %v166_v29 = vsel %vm165_vm7, %v113_v3, 1e+09 }
 0x1c3   : >> { %v167_v30 = vsel %vm161_vm6, %v166_v29, inf }
 0x1c4   : >> { %168 = vmin.xlane.f32.xlu1 %v167_v30 }
 0x250   : > { %125 = sbr.rel (!%p123_p4) target bundleno = 17 (0x11), region = 61 }
 0x251   : >> { %v169_v31 = vpop.xlane.xlu1 %168 }
 0x252   : >> { %v232_v32 = vtrunc.f32 %v169_v31 }
 0x254   : >> { %v233_v33 = vcvt.f32.s32 %v232_v32 }
 0x256   : >> { %171 = vst.msk [vmem:[#allocation3] sm:$0x1] %vm117_vm0, %v233_v33 }
 0x257 PF: > { %s11_s6 = sadd.s32 1, %s264_s6  }
 0x258   : > { %p8_p5 = scmp.ge.s32.totalorder %s11_s6, 4  }
 0x25a   :  { %10 = sbr.rel (!%p8_p5) target bundleno = 1 (0x1), region = 72 }

// kernel: transition_down.4
= control target key start
LH: loop header
LB: loop body
LE: loop exit
PB: predicated region body
PF: predicated region fallthrough
CT: control target
= control target key end

     0   :  { %s631_s9 = smov 0   ;;  %s633_s10 = smov 0   ;;  %s823_s0 = inlined_call_operand.vmem [shape: f32[2,8,3], index: 0, kind: input, shape index: {}]   ;;  %s824_s1 = inlined_call_operand.vmem [shape: f32[2,3,128], index: 1, kind: input, shape index: {}]   ;;  %s825_s2 = inlined_call_operand.vmem [shape: s32[2,8,4], index: 2, kind: output, shape index: {}]  }
   0x1   :  { %s635_s11 = smov 0  }
   0x2 LB: > { %s31_s12 = sadd.s32 1, %s605_s10  ;;  %p540_p0 = scmp.ge.s32.totalorder %s609_s11, 1  ;;  %s609_s11 = sphi %s635_s11, %s12_s11   ;;  %s605_s10 = sphi %s633_s10, %s827_s10   ;;  %s601_s9 = sphi %s631_s9, %s826_s9  }
   0x3   : > { %p33_p1 = scmp.ge.s32.totalorder %s31_s12, 2  ;;  %p151_p2 = scmp.lt.s32.totalorder %s609_s11, 3 }
   0x5   : > { %s829_s12 = smov (%p33_p1, %s31_s12), 0  ;;  %p152_p3 = pnand %p540_p0, %p151_p2 }
   0x6   : > { %vm209_vm0 = vcmask (!%p152_p3), 31744   ;;  %p184_p4 = scmp.lt.s32.totalorder (!%p152_p3), %s601_s9, 1  ;;  %v611_v0 = vmov (!%p152_p3), inf   ;;  %v612_v1 = vmov (!%p152_p3), 0   ;;  %v613_v2 = vmov (!%p152_p3), 2  }
   0x7   : > { %155 = sbr.rel (%p152_p3) target bundleno = 1354 (0x54a), region = 28  ;;  %210 = vst.msk [vmem:[#allocation2] sm:$0xff] (!%p152_p3), %vm209_vm0, %v611_v0  ;;  %583 = vset.pattern.permute.xlu0 (!%p152_p3), %v612_v1  ;;  %211 = vst.msk [vmem:[#allocation3] sm:$0xff] (!%p152_p3), %vm209_vm0, %v612_v1  ;;  %585 = vset.pattern.permute.xlu1 (!%p152_p3), %v613_v2  ;;  %v614_v6 = vmov (!%p152_p3), 1   ;;  %v219_v7 = vlaneseq (!%p152_p3)  ;;  %vm615_vm6 = vmmov (!%p152_p3), 1  }
   0x9   : > { %v220_v8 = vshrl.u32 (!%p152_p3), %v219_v7, 7  ;;  %v664_v13 = vand.u32 (!%p152_p3), 127, %v219_v7 }
   0xb   : > { %v221_v10 = vsub.s32 (!%p152_p3), 0, %v220_v8  ;;  %v232_v11 = vsub.s32 (!%p152_p3), 1, %v220_v8  ;;  %v243_v17 = vsub.s32 (!%p152_p3), 2, %v220_v8  ;;  %v667_v18 = vcvt.s32.f32 (!%p152_p3), %v664_v13 }
   0xc   : > { %vm254_vm2 = vcmp.lt.s32.totalorder (!%p152_p3), %v664_v13, 16 }
   0xe   : > { %s831_s9 = smov (!%p184_p4, %s601_s9), 1  ;;  %v256_v4 = vld [vmem:[#allocation2] sm:$0xff]  ;;  %v257_v58 = vld [vmem:[#allocation3] sm:$0xff] }
   0xf   : > { %s541_s13 = sshll.u32 %s831_s9, 3  ;;  %v261_v5 = vsel %vm209_vm0, %v256_v4, inf  ;;  %s542_s17 = sshll.u32 %s831_s9, 2 }
  0x10   : > { %s190_s16 = scalar_lea.vmem %s823_s0, %s541_s13  ;;  %262 = vmin.xlane.f32.xlu1 %v261_v5  ;;  %s197_s20 = scalar_lea.vmem %s824_s1, %s542_s17 }
  0x11   : > { %v212_v3 = vld [vmem:[%s190_s16] sm:$0xff]  ;;  %s204_s23 = scalar_lea.vmem %s825_s2, %s541_s13 }
  0x12   : > { %216 = vperm.xlu0 %583, %v212_v3   ;;  %v213_v12 = vld [vmem:[%s197_s20] sm:$0x7] }
  0x13   : > { %v222_v14 = vrot.slane %v213_v12, %v221_v10  ;;  %v233_v15 = vrot.slane %v213_v12, %v232_v11  ;;  %v244_v22 = vrot.slane %v213_v12, %v243_v17 }
  0x16   : > { %584 = vset.pattern.permute.xlu0 %v614_v6 }
  0x17   : > { %227 = vperm.xlu0 %584, %v212_v3  }
  0x1b   : > { %586 = vset.pattern.permute.xlu0 %v613_v2 }
  0x21   : > { %238 = vperm.xlu1 %585, %v212_v3  }
  0x91   : > { %v217_v9 = vpop.permute.xlu0 %216 }
  0x92   : > { %v223_v19 = vsub.f32 %v217_v9, %v222_v14 }
  0x94   : > { %v224_v24 = vmul.f32 %v223_v19, %v223_v19 }
  0x96   : > { %v228_v16 = vpop.permute.xlu0 %227 }
  0x97   : > { %v234_v20 = vsub.f32 %v228_v16, %v233_v15 }
  0x99   : > { %v235_v25 = vmul.f32 %v234_v20, %v234_v20 }
  0x9b   : > { %v236_v29 = vadd.f32 %v235_v25, %v224_v24 }
  0x9d   : > { %v669_v21 = vpop.xlane.xlu1 %262 }
  0x9e   : > { %vm270_vm1 = vcmp.eq.f32.partialorder %v256_v4, %v669_v21 }
  0x9f   : > { %v271_v23 = vsel %vm270_vm1, %v667_v18, 1e+09 }
  0xa0   : > { %v272_v26 = vsel %vm209_vm0, %v271_v23, inf }
  0xa1   : > { %273 = vmin.xlane.f32.xlu1 %v272_v26  ;;  %v239_v27 = vpop.permute.xlu1 %238 }
  0xa2   : > { %v245_v28 = vsub.f32 %v239_v27, %v244_v22 }
  0xa4   : > { %v246_v30 = vmul.f32 %v245_v28, %v245_v28 }
  0xa6   : > { %v247_v31 = vadd.f32 %v246_v30, %v236_v29 }
  0xa8   : > { %v255_v32 = vsel %vm254_vm2, %v247_v31, inf }
  0xa9   : > { %258 = vmin.xlane.f32.xlu0 %v255_v32 }
 0x12e   : > { %v675_v33 = vpop.xlane.xlu1 %273 }
 0x12f   : > { %vm277_vm5 = vcmp.eq.f32.partialorder %v667_v18, %v675_v33 }
 0x130   : > { %v278_v2 = vsel %vm277_vm5, %v257_v58, 0 }
 0x131   : > { %v279_v5 = vsel %vm209_vm0, %v278_v2, 0 }
 0x132   : > { %v281_v9 = vshrl.u32 %v279_v5, 16  ;;  %v280_v12 = vand.u32 65535, %v279_v5 }
 0x134   : > { %v283_v11 = vcvt.s32.f32 %v281_v9  ;;  %v282_v14 = vcvt.s32.f32 %v280_v12 }
 0x136   : > { %v677_v34 = vpop.xlane.xlu0 %258 }
 0x137   : > { %vm264_vm3 = vcmp.lt.f32.partialorder %v677_v34, %v669_v21  ;;  %vm266_vm4 = vcmp.eq.f32.partialorder %v255_v32, %v677_v34  ;;  %v265_v20 = vmin.f32 %v677_v34, %v669_v21 }
 0x138   : > { %v267_v35 = vsel %vm266_vm4, %v667_v18, 1e+09  ;;  %vm301_vm7 = vmxor %vm264_vm3, %vm615_vm6 }
 0x139   : > { %268 = vmin.xlane.f32.xlu0 %v267_v35  ;;  %vm304_vm8 = vmand %vm277_vm5, %vm301_vm7  ;;  %vm293_vm5 = vcmp.eq.s32.totalorder %v664_v13, 0 }
 0x13a   : > { %v305_v36 = vsel %vm304_vm8, inf, %v256_v4  ;;  %v294_v24 = vsel %vm293_vm5, %v265_v20, 0.0 }
 0x13b   : > { %v308_v37 = vsel %vm209_vm0, %v305_v36, inf }
 0x13d   : > { %309 = vmin.xlane.f32.xlu0 %v308_v37 }
 0x1c6   : > { %v693_v38 = vpop.xlane.xlu0 %268 }
 0x1c7   : > { %vm296_vm9 = vcmp.eq.f32.partialorder %v667_v18, %v693_v38 }
 0x1c8   : > { %vm299_vm10 = vmand %vm296_vm9, %vm264_vm3 }
 0x1c9   : > { %v300_v39 = vsel %vm299_vm10, inf, %v255_v32 }
 0x1ca   : > { %v700_v40 = vpop.xlane.xlu0 %309  ;;  %306 = vmin.xlane.f32.xlu0 %v300_v39 }
 0x1cb   : > { %vm317_vm11 = vcmp.eq.f32.partialorder %v305_v36, %v700_v40 }
 0x1cc   : > { %v318_v41 = vsel %vm317_vm11, %v667_v18, 1e+09 }
 0x1cd   : > { %v319_v42 = vsel %vm209_vm0, %v318_v41, inf }
 0x1ce   : > { %320 = vmin.xlane.f32.xlu0 %v319_v42 }
 0x257   : > { %v705_v43 = vpop.xlane.xlu0 %306 }
 0x258   : > { %vm313_vm12 = vcmp.eq.f32.partialorder %v300_v39, %v705_v43  ;;  %vm311_vm13 = vcmp.lt.f32.partialorder %v705_v43, %v700_v40  ;;  %v312_v22 = vmin.f32 %v705_v43, %v700_v40 }
 0x259   : > { %v314_v44 = vsel %vm313_vm12, %v667_v18, 1e+09  ;;  %vm348_vm14 = vmxor %vm311_vm13, %vm615_vm6 }
 0x25a   : > { %315 = vmin.xlane.f32.xlu1 %v314_v44 }
 0x25b   : > { %v321_v45 = vpop.xlane.xlu0 %320 }
 0x25c   : > { %vm324_vm15 = vcmp.eq.f32.partialorder %v667_v18, %v321_v45 }
 0x25d   : > { %vm351_vm1 = vmand %vm324_vm15, %vm348_vm14  ;;  %v325_v59 = vsel %vm324_vm15, %v257_v58, 0 }
 0x25e   : > { %v352_v46 = vsel %vm351_vm1, inf, %v305_v36  ;;  %v326_v60 = vsel %vm209_vm0, %v325_v59, 0  ;;  %vm340_vm1 = vcmp.eq.s32.totalorder %v664_v13, 1 }
 0x25f   : > { %v355_v47 = vsel %vm209_vm0, %v352_v46, inf  ;;  %v328_v63 = vshrl.u32 %v326_v60, 16  ;;  %v327_v15 = vand.u32 65535, %v326_v60  ;;  %v341_v26 = vsel %vm340_vm1, %v312_v22, %v294_v24 }
 0x260   : > { %356 = vmin.xlane.f32.xlu0 %v355_v47 }
 0x261   : > { %v330_v3 = vcvt.s32.f32 %v328_v63  ;;  %v329_v16 = vcvt.s32.f32 %v327_v15 }
 0x2e7   : > { %v719_v48 = vpop.xlane.xlu1 %315 }
 0x2e8   : > { %vm343_vm2 = vcmp.eq.f32.partialorder %v667_v18, %v719_v48  ;;  %v548_v59 = vtrunc.f32 %v719_v48 }
 0x2e9   : > { %vm346_vm4 = vmand %vm343_vm2, %vm311_vm13  ;;  %vm387_vm2 = vcmp.eq.s32.totalorder %v664_v13, 2 }
 0x2ea   : > { %v347_v49 = vsel %vm346_vm4, inf, %v300_v39  ;;  %vm434_vm4 = vcmp.eq.s32.totalorder %v664_v13, 3 }
 0x2eb   : > { %353 = vmin.xlane.f32.xlu1 %v347_v49 }
 0x2ed   : > { %v726_v50 = vpop.xlane.xlu0 %356 }
 0x2ee   : > { %vm364_vm7 = vcmp.eq.f32.partialorder %v352_v46, %v726_v50 }
 0x2ef   : > { %v365_v51 = vsel %vm364_vm7, %v667_v18, 1e+09 }
 0x2f0   : > { %v366_v52 = vsel %vm209_vm0, %v365_v51, inf }
 0x2f1   : > { %367 = vmin.xlane.f32.xlu0 %v366_v52 }
 0x378   : > { %v731_v53 = vpop.xlane.xlu1 %353 }
 0x379   : > { %vm360_vm8 = vcmp.eq.f32.partialorder %v347_v49, %v731_v53  ;;  %vm358_vm9 = vcmp.lt.f32.partialorder %v731_v53, %v726_v50  ;;  %v359_v23 = vmin.f32 %v731_v53, %v726_v50 }
 0x37a   : > { %v361_v54 = vsel %vm360_vm8, %v667_v18, 1e+09  ;;  %vm395_vm11 = vmxor %vm358_vm9, %vm615_vm6 }
 0x37b   : > { %362 = vmin.xlane.f32.xlu0 %v361_v54  ;;  %v388_v28 = vsel %vm387_vm2, %v359_v23, %v341_v26 }
 0x37e   : > { %v368_v55 = vpop.xlane.xlu0 %367 }
 0x37f   : > { %vm371_vm10 = vcmp.eq.f32.partialorder %v667_v18, %v368_v55 }
 0x380   : > { %vm398_vm12 = vmand %vm371_vm10, %vm395_vm11  ;;  %v372_v61 = vsel %vm371_vm10, %v257_v58, 0 }
 0x381   : > { %v399_v56 = vsel %vm398_vm12, inf, %v352_v46  ;;  %v373_v0 = vsel %vm209_vm0, %v372_v61, 0 }
 0x382   : > { %v402_v57 = vsel %vm209_vm0, %v399_v56, inf  ;;  %v375_v4 = vshrl.u32 %v373_v0, 16  ;;  %v374_v17 = vand.u32 65535, %v373_v0 }
 0x383   : > { %403 = vmin.xlane.f32.xlu1 %v402_v57 }
 0x384   : > { %v377_v8 = vcvt.s32.f32 %v375_v4  ;;  %v376_v19 = vcvt.s32.f32 %v374_v17 }
 0x408   : > { %v746_v62 = vpop.xlane.xlu0 %362 }
 0x409   : > { %vm390_vm14 = vcmp.eq.f32.partialorder %v667_v18, %v746_v62 }
 0x40a   : > { %vm393_vm6 = vmand %vm390_vm14, %vm358_vm9 }
 0x40b   : > { %v394_v1 = vsel %vm393_vm6, inf, %v347_v49 }
 0x40c   : > { %400 = vmin.xlane.f32.xlu0 %v394_v1 }
 0x410   : > { %v758_v6 = vpop.xlane.xlu1 %403  ;;  %333 = vadd.xlane.f32.xlu0 %v330_v3 }
 0x411   : > { %vm411_vm15 = vcmp.eq.f32.partialorder %v399_v56, %v758_v6  ;;  %v546_v56 = vtrunc.f32 %v693_v38 }
 0x412   : > { %v412_v7 = vsel %vm411_vm15, %v667_v18, 1e+09 }
 0x413   : > { %v413_v10 = vsel %vm209_vm0, %v412_v7, inf  ;;  %v547_v3 = vcvt.f32.s32 %v546_v56  ;;  %v549_v7 = vcvt.f32.s32 %v548_v59 }
 0x414   : > { %414 = vmin.xlane.f32.xlu1 %v413_v10  ;;  %380 = vadd.xlane.f32.xlu0 %v377_v8 }
 0x418   : > { %286 = vadd.xlane.f32.xlu1 %v283_v11 }
 0x41c   : > { %284 = vadd.xlane.f32.xlu1 %v282_v14 }
 0x420   : > { %331 = vadd.xlane.f32.xlu1 %v329_v16 }
 0x424   : > { %378 = vadd.xlane.f32.xlu1 %v376_v19 }
 0x499   : > { %v401_v25 = vpop.xlane.xlu0 %400 }
 0x49a   : > { %v406_v27 = vmin.f32 %v401_v25, %v758_v6  ;;  %vm407_vm8 = vcmp.eq.f32.partialorder %v394_v1, %v401_v25  ;;  %vm405_vm10 = vcmp.lt.f32.partialorder %v401_v25, %v758_v6 }
 0x49b   : > { %v408_v39 = vsel %vm407_vm8, %v667_v18, 1e+09 }
 0x49c   : > { %v435_v29 = vsel %vm434_vm4, %v406_v27, %v388_v28 }
 0x49d   : > { %437 = vst.msk [vmem:[#allocation2] sm:$0xff] %vm209_vm0, %v435_v29  ;;  %v334_v44 = vpop.xlane.xlu0 %333 }
 0x49e   : > { %v336_v49 = vcvt.f32.s32 %v334_v44 }
 0x4a0   : > { %v337_v60 = vshll.u32 %v336_v49, 16 }
 0x4a1   : > { %v415_v30 = vpop.xlane.xlu1 %414  ;;  %v381_v46 = vpop.xlane.xlu0 %380 }
 0x4a2   : > { %vm418_vm7 = vcmp.eq.f32.partialorder %v667_v18, %v415_v30  ;;  %v383_v52 = vcvt.f32.s32 %v381_v46  ;;  %v550_v18 = vtrunc.f32 %v746_v62 }
 0x4a3   : > { %v419_v31 = vsel %vm418_vm7, %v257_v58, 0 }
 0x4a4   : > { %v420_v32 = vsel %vm209_vm0, %v419_v31, 0  ;;  %v384_v61 = vshll.u32 %v383_v52, 16  ;;  %v551_v9 = vcvt.f32.s32 %v550_v18 }
 0x4a5   : > { %v422_v33 = vshrl.u32 %v420_v32, 16  ;;  %v421_v35 = vand.u32 65535, %v420_v32  ;;  %v287_v41 = vpop.xlane.xlu1 %286 }
 0x4a6   : > { %v289_v47 = vcvt.f32.s32 %v287_v41 }
 0x4a7   : > { %v424_v36 = vcvt.s32.f32 %v422_v33  ;;  %v423_v37 = vcvt.s32.f32 %v421_v35 }
 0x4a8   : > { %v290_v57 = vshll.u32 %v289_v47, 16 }
 0x4a9   : > { %427 = vadd.xlane.f32.xlu0 %v424_v36  ;;  %425 = vadd.xlane.f32.xlu1 %v423_v37  ;;  %v285_v42 = vpop.xlane.xlu1 %284 }
 0x4aa   : > { %v288_v54 = vcvt.f32.s32 %v285_v42 }
 0x4ac   : > { %v291_v63 = vadd.s32 %v290_v57, %v288_v54 }
 0x4ad   : > { %409 = vmin.xlane.f32.xlu0 %v408_v39  ;;  %v332_v45 = vpop.xlane.xlu1 %331 }
 0x4ae   : > { %v335_v55 = vcvt.f32.s32 %v332_v45  ;;  %v292_v38 = vsel %vm264_vm3, %v547_v3, %v291_v63 }
 0x4af   : > { %v295_v14 = vsel %vm293_vm5, %v292_v38, 0 }
 0x4b0   : > { %v338_v1 = vadd.s32 %v337_v60, %v335_v55 }
 0x4b1   : > { %v379_v51 = vpop.xlane.xlu1 %378 }
 0x4b2   : > { %v382_v58 = vcvt.f32.s32 %v379_v51  ;;  %v339_v62 = vsel %vm311_vm13, %v549_v7, %v338_v1 }
 0x4b3   : > { %v342_v21 = vsel %vm340_vm1, %v339_v62, %v295_v14 }
 0x4b4   : > { %v385_v4 = vadd.s32 %v384_v61, %v382_v58 }
 0x4b6   : > { %v386_v12 = vsel %vm358_vm9, %v551_v9, %v385_v4 }
 0x4b7   : > { %v389_v34 = vsel %vm387_vm2, %v386_v12, %v342_v21 }
 0x536   : > { %v428_v0 = vpop.xlane.xlu0 %427  ;;  %v426_v5 = vpop.xlane.xlu1 %425 }
 0x537   : > { %v430_v2 = vcvt.f32.s32 %v428_v0  ;;  %v429_v10 = vcvt.f32.s32 %v426_v5 }
 0x539   : > { %v431_v8 = vshll.u32 %v430_v2, 16 }
 0x53a   : > { %v410_v48 = vpop.xlane.xlu0 %409 }
 0x53b   : > { %v552_v11 = vtrunc.f32 %v410_v48  ;;  %v432_v15 = vadd.s32 %v431_v8, %v429_v10 }
 0x53d   : > { %v553_v16 = vcvt.f32.s32 %v552_v11 }
 0x53f   : > { %v433_v40 = vsel %vm405_vm10, %v553_v16, %v432_v15 }
 0x540   : > { %v436_v43 = vsel %vm434_vm4, %v433_v40, %v389_v34 }
 0x541   : > { %438 = vst.msk [vmem:[#allocation3] sm:$0xff] %vm209_vm0, %v436_v43 }
 0x548   : > { %v442_v50 = vld [vmem:[#allocation3] sm:$0xff] }
 0x549   : > { %443 = vst.msk [vmem:[%s204_s23] sm:$0xff] %vm209_vm0, %v442_v50 }
 0x54a PF: > { %s12_s11 = sadd.s32 1, %s609_s11   ;;  %s826_s9 = smov %s605_s10 }
 0x54b   : > { %p9_p5 = scmp.ge.s32.totalorder %s12_s11, 4   ;;  %s827_s10 = smov %s829_s12 }
 0x54d   :  { %11 = sbr.rel (!%p9_p5) target bundleno = 2 (0x2), region = 69 }

// kernel: transition_down.5
= control target key start
LH: loop header
LB: loop body
LE: loop exit
PB: predicated region body
PF: predicated region fallthrough
CT: control target
= control target key end

     0   :  { %10 = vsyncpa [#allocation3], 0  ;;  %s1399_s0 = inlined_call_operand.vmem [shape: bf16[2,4,8,16], index: 0, kind: input, shape index: {}]   ;;  %s1400_s1 = inlined_call_operand.vmem [shape: bf16[16,128], index: 1, kind: input, shape index: {}]   ;;  %s1401_s2 = inlined_call_operand.vmem [shape: f32[1,128], index: 2, kind: input, shape index: {}]   ;;  %s1402_s3 = inlined_call_operand.vmem [shape: bf16[128,128], index: 3, kind: input, shape index: {}]   ;;  %s1403_s4 = inlined_call_operand.vmem [shape: f32[1,128], index: 4, kind: input, shape index: {}]   ;;  %s1404_s5 = inlined_call_operand.hbm [shape: f32[2,8,128], index: 5, kind: output, shape index: {}]  }
   0x1   :  { %12 = vsyncpa [#allocation3 + $0x1], 0  ;;  %s1138_s18 = smov 0   ;;  %s1140_s19 = smov 0  }
   0x2   :  { %s1142_s20 = smov 0   ;;  %s1144_s21 = smov 0  }
   0x3   :  { %s1146_s22 = smov 0   ;;  %s1148_s23 = smov 0  }
   0x4 LB: > { %s780_s24 = sadd.s32 4294967295, %s1103_s23   ;;  %s781_s25 = sadd.s32 4294967294, %s1103_s23   ;;  %s1103_s23 = sphi %s1148_s23, %s18_s23   ;;  %s1099_s22 = sphi %s1146_s22, %s1411_s22   ;;  %s1095_s21 = sphi %s1144_s21, %s1410_s21   ;;  %s1091_s20 = sphi %s1142_s20, %s1409_s20   ;;  %s1087_s19 = sphi %s1140_s19, %s1408_s19   ;;  %s1083_s18 = sphi %s1138_s18, %s1407_s18  }
   0x5   : > { %s30_s26 = sadd.s32 1, %s1099_s22  ;;  %s151_s27 = sadd.s32 1, %s1091_s20 }
   0x6   : > { %p32_p0 = scmp.ge.s32.totalorder %s30_s26, 2  ;;  %p161_p1 = scmp.ne.s32.totalorder %s1091_s20, %s1087_s19 }
   0x7   : > { %p162_p2 = scmp.eq.s32.totalorder %s780_s24, 1  ;;  %p167_p3 = scmp.ne.s32.totalorder %s1087_s19, %s1083_s18 }
   0x8   : > { %s1413_s26 = smov (%p32_p0, %s30_s26), 0  ;;  %p168_p5 = scmp.eq.s32.totalorder %s781_s25, 1 }
   0x9   : > { %p1178_p4 = por %p162_p2, %p161_p1  ;;  %s146_s29 = ssub.s32 %s1099_s22, %s1413_s26 }
   0xa   : > { %p784_p6 = scmp.ge.s32.totalorder %s1103_s23, 1  ;;  %p149_p7 = scmp.eq.s32.totalorder %s146_s29, 0 }
   0xb   : > { %p1185_p8 = por %p168_p5, %p167_p3  ;;  %p209_p9 = scmp.lt.s32.totalorder %s1103_s23, 3 }
   0xc   : > { %s1191_s6 = scalar_select %p149_p7, %s1091_s20, %s151_s27  }
   0xd   : > { %p210_p10 = pnand %p784_p6, %p209_p9 }
   0xe   : > { %v1196_v0 = vld [vmem:[%s1400_s1] sm:$0xff] (!%p210_p10)   ;;  %v1105_v1 = vmov (!%p210_p10), 0.0   ;;  %p240_p11 = scmp.lt.s32.totalorder (!%p210_p10), %s1095_s21, 1  ;;  %vm1106_vm0 = vmmov (!%p210_p10), 0   ;;  %vm282_vm1 = vcmask (!%p210_p10), 130048   ;;  %v1229_v5 = vld [vmem:[%s1402_s3 + $0x8] sm:$0xff] (!%p210_p10)  }
   0xf   : > { %213 = sbr.rel (%p210_p10) target bundleno = 705 (0x2c1), region = 40  ;;  %855 = vmatprep.subr.bf16.mxu1 (!%p210_p10), %v1105_v1  ;;  %881 = vmatprep.subr.bf16.mxu0 (!%p210_p10), %v1105_v1  ;;  %v1213_v2 = vld [vmem:[%s1402_s3] sm:$0xff] (!%p210_p10)   ;;  %v1242_v6 = vld [vmem:[%s1402_s3 + $0x10] sm:$0xff] (!%p210_p10)   ;;  %v1251_v7 = vld [vmem:[%s1402_s3 + $0x18] sm:$0xff] (!%p210_p10)   ;;  %s237_s25 = sand.u32 (!%p210_p10), 1, %s1087_s19  }
  0x10   : > { %856 = vmatpush3.bf16.msra.mxu1 (!%p210_p10), %v1196_v0  ;;  %882 = vmatpush3.bf16.msra.mxu0 (!%p210_p10), %v1196_v0  ;;  %v1260_v8 = vld [vmem:[%s1402_s3 + $0x20] sm:$0xff] (!%p210_p10)   ;;  %v1269_v9 = vld [vmem:[%s1402_s3 + $0x28] sm:$0xff] (!%p210_p10)   ;;  %v1278_v10 = vld [vmem:[%s1402_s3 + $0x30] sm:$0xff] (!%p210_p10)   ;;  %s785_s27 = sshll.u32 (!%p210_p10), %s237_s25, 3  ;;  %s807_s29 = sshll.u32 (!%p210_p10), %s1095_s21, 7 }
  0x11   : > { %857 = vmatprep.mubr.msk.bf16.mxu1 (!%p210_p10), %vm1106_vm0, %v1105_v1  ;;  %883 = vmatprep.mubr.msk.bf16.mxu0 (!%p210_p10), %vm1106_vm0, %v1105_v1  ;;  %v1024_v11 = vld [vmem:[%s1402_s3 + $0x38] sm:$0xff] (!%p210_p10)   ;;  %v1294_v12 = vld [vmem:[%s1401_s2] ss:$0 sm:$0xff] (!%p210_p10)  ;;  %s239_s7 = scalar_lea.vmem (!%p210_p10), [#allocation2], %s785_s27  ;;  %s1352_s11 = scalar_lea.hbm (!%p210_p10), %s1404_s5, %s807_s29 }
  0x12   : > { %861 = vmatprep.subr.bf16.mxu1 (!%p210_p10), %v1105_v1  ;;  %887 = vmatprep.subr.bf16.mxu0 (!%p210_p10), %v1105_v1  ;;  %v791_v29 = vld [vmem:[%s1403_s4] ss:$0 sm:$0xff] (!%p210_p10)  ;;  %s706_s8 = sshll.u32 (!%p210_p10), %s239_s7, 4  ;;  %s692_s12 = scalar_lea.sflag (!%p210_p10), [#allocation3], %s237_s25  ;;  %s1354_s8 = int_to_ptr.vmem [resolvable:$true] %s706_s8 }
  0x13   : > { %s1025_s13 = scalar_lea.vmem (!%p210_p10), %s1354_s8, 128 }
  0x14   : > { %p1026_p12 = scmp.ne.s32.totalorder (!%p210_p10), %s1354_s8, %s1025_s13 }
  0x16   : > { %s241_s9 = scalar_select %p240_p11, %s1095_s21, 1 }
  0x17   : > { %p1027_p13 = pnand %p1026_p12, %p1178_p4  ;;  %s1107_s21 = smov [#allocation2]  }
  0x18   : > { %s810_s10 = sshll.u32 %s241_s9, 4  ;;  %s1029_s14 = sshll.u32 %s1107_s21, 4  ;;  %s1030_s14 = int_to_ptr.vmem [resolvable:$false] %s1029_s14 }
  0x19   : > { %s1218_s15 = scalar_lea.vmem %s1399_s0, %s810_s10  ;;  %p1028_p0 = pneg %p1027_p13 }
  0x1a   : > { %v269_v3 = vld [vmem:[%s1218_s15] sm:$0xf]  ;;  %v800_v4 = vld [vmem:[%s1218_s15 + $0x4] sm:$0xf]  ;;  %v802_v27 = vld [vmem:[%s1218_s15 + $0x8] sm:$0xf]  ;;  %p1032_p1 = scmp.lt.s32.totalorder %s1354_s8, %s1030_s14 }
  0x1b   : > { %858 = vmatmul.mubr.msk.bf16.vlgmr.msra.gmra.mrb[0].mxu1 %vm282_vm1, %v269_v3  ;;  %884 = vmatmul.mubr.msk.bf16.vlgmr.msra.gmra.mrb[0].mxu0 %vm282_vm1, %v800_v4  ;;  %v804_v28 = vld [vmem:[%s1218_s15 + $0xc] sm:$0xf]  ;;  %s1031_s16 = scalar_lea.vmem %s1030_s14, 256 }
  0x1c   : > { %862 = vmatpush3.bf16.msra.mxu1 %v1213_v2  ;;  %888 = vmatpush3.bf16.msra.mxu0 %v1213_v2  ;;  %p1033_p2 = scmp.lt.s32.totalorder %s1031_s16, %s1025_s13 }
  0x1d   : > { %863 = vmatprep.subr.bf16.mxu1 %v1105_v1  ;;  %889 = vmatprep.subr.bf16.mxu0 %v1105_v1 }
  0x1e   : > { %877 = vmatprep.mubr.msk.bf16.mxu1 %vm1106_vm0, %v1105_v1  ;;  %903 = vmatprep.mubr.msk.bf16.mxu0 %vm1106_vm0, %v1105_v1  ;;  %p1034_p3 = por %p1033_p2, %p1032_p1 }
  0x20   : > { %864 = vmatpush3.bf16.msra.mxu1 %v1229_v5  ;;  %890 = vmatpush3.bf16.msra.mxu0 %v1229_v5  ;;  %p1035_p5 = pnand %p1034_p3, %p1028_p0 }
  0x21   : > { %865 = vmatprep.subr.bf16.mxu1 %v1105_v1  ;;  %891 = vmatprep.subr.bf16.mxu0 %v1105_v1 }
  0x24   : > { %866 = vmatpush3.bf16.msra.mxu1 %v1242_v6  ;;  %892 = vmatpush3.bf16.msra.mxu0 %v1242_v6 }
  0x25   : > { %867 = vmatprep.subr.bf16.mxu1 %v1105_v1  ;;  %893 = vmatprep.subr.bf16.mxu0 %v1105_v1 }
  0x28   : > { %868 = vmatpush3.bf16.msra.mxu1 %v1251_v7  ;;  %894 = vmatpush3.bf16.msra.mxu0 %v1251_v7 }
  0x29   : > { %869 = vmatprep.subr.bf16.mxu1 %v1105_v1  ;;  %895 = vmatprep.subr.bf16.mxu0 %v1105_v1 }
  0x2c   : > { %870 = vmatpush3.bf16.msra.mxu1 %v1260_v8  ;;  %896 = vmatpush3.bf16.msra.mxu0 %v1260_v8 }
  0x2d   : > { %871 = vmatprep.subr.bf16.mxu1 %v1105_v1  ;;  %897 = vmatprep.subr.bf16.mxu0 %v1105_v1 }
  0x30   : > { %872 = vmatpush3.bf16.msra.mxu1 %v1269_v9  ;;  %898 = vmatpush3.bf16.msra.mxu0 %v1269_v9 }
  0x31   : > { %873 = vmatprep.subr.bf16.mxu1 %v1105_v1  ;;  %899 = vmatprep.subr.bf16.mxu0 %v1105_v1 }
  0x34   : > { %874 = vmatpush3.bf16.msra.mxu1 %v1278_v10  ;;  %900 = vmatpush3.bf16.msra.mxu0 %v1278_v10 }
  0x35   : > { %875 = vmatprep.subr.bf16.mxu1 %v1105_v1  ;;  %901 = vmatprep.subr.bf16.mxu0 %v1105_v1 }
  0x38   : > { %876 = vmatpush3.bf16.msra.mxu1 %v1024_v11  ;;  %902 = vmatpush3.bf16.msra.mxu0 %v1024_v11 }
  0x39   : > { %907 = vmatprep.subr.bf16.mxu1 %v1105_v1  ;;  %933 = vmatprep.subr.bf16.mxu0 %v1105_v1 }
  0xee   : > { %v320_v13 = vpop.f32.mrb[0].mxu1  ;;  %v462_v14 = vpop.f32.mrb[0].mxu0 }
  0xef   : > { %v321_v15 = vadd.f32 %v1294_v12, %v320_v13  ;;  %v463_v16 = vadd.f32 %v1294_v12, %v462_v14  ;;  %v859_v17 = vpop.f32.mrb[1].mxu1  ;;  %v885_v18 = vpop.f32.mrb[1].mxu0 }
  0xf0   : > { %v323_v19 = vpop.f32.mrb[2].mxu1  ;;  %v465_v20 = vpop.f32.mrb[2].mxu0 }
  0xf1   : > { %v326_v21 = vmax.f32 %v321_v15, 0.0  ;;  %v468_v22 = vmax.f32 %v463_v16, 0.0  ;;  %v860_v23 = vpop.f32.mrb[3].mxu1  ;;  %v886_v24 = vpop.f32.mrb[3].mxu0 }
  0xf3   : > { %v327_v25 = vpack.c.bf16 %v326_v21, %v326_v21  ;;  %v469_v26 = vpack.c.bf16 %v468_v22, %v468_v22 }
  0xf5   : > { %878 = vmatmul.mubr.bf16.vlgmr.msra.gmra.mrb[4].mxu1 %v327_v25  ;;  %904 = vmatmul.mubr.bf16.vlgmr.msra.gmra.mrb[4].mxu0 %v469_v26 }
  0xf6   : > { %908 = vmatpush3.bf16.msra.mxu1 %v1196_v0  ;;  %934 = vmatpush3.bf16.msra.mxu0 %v1196_v0 }
  0xf7   : > { %909 = vmatprep.mubr.msk.bf16.mxu1 %vm1106_vm0, %v1105_v1  ;;  %935 = vmatprep.mubr.msk.bf16.mxu0 %vm1106_vm0, %v1105_v1 }
  0xf8   : > { %913 = vmatprep.subr.bf16.mxu1 %v1105_v1  ;;  %939 = vmatprep.subr.bf16.mxu0 %v1105_v1 }
  0xfd   : > { %910 = vmatmul.mubr.msk.bf16.vlgmr.msra.gmra.mrb[8].mxu1 %vm282_vm1, %v802_v27  ;;  %936 = vmatmul.mubr.msk.bf16.vlgmr.msra.gmra.mrb[8].mxu0 %vm282_vm1, %v804_v28 }
  0xfe   : > { %914 = vmatpush3.bf16.msra.mxu1 %v1213_v2  ;;  %940 = vmatpush3.bf16.msra.mxu0 %v1213_v2 }
  0xff   : > { %915 = vmatprep.subr.bf16.mxu1 %v1105_v1  ;;  %941 = vmatprep.subr.bf16.mxu0 %v1105_v1 }
 0x100   : > { %929 = vmatprep.mubr.msk.bf16.mxu1 %vm1106_vm0, %v1105_v1  ;;  %955 = vmatprep.mubr.msk.bf16.mxu0 %vm1106_vm0, %v1105_v1 }
 0x102   : > { %916 = vmatpush3.bf16.msra.mxu1 %v1229_v5  ;;  %942 = vmatpush3.bf16.msra.mxu0 %v1229_v5 }
 0x103   : > { %917 = vmatprep.subr.bf16.mxu1 %v1105_v1  ;;  %943 = vmatprep.subr.bf16.mxu0 %v1105_v1 }
 0x106   : > { %918 = vmatpush3.bf16.msra.mxu1 %v1242_v6  ;;  %944 = vmatpush3.bf16.msra.mxu0 %v1242_v6 }
 0x107   : > { %919 = vmatprep.subr.bf16.mxu1 %v1105_v1  ;;  %945 = vmatprep.subr.bf16.mxu0 %v1105_v1 }
 0x10a   : > { %920 = vmatpush3.bf16.msra.mxu1 %v1251_v7  ;;  %946 = vmatpush3.bf16.msra.mxu0 %v1251_v7 }
 0x10b   : > { %921 = vmatprep.subr.bf16.mxu1 %v1105_v1  ;;  %947 = vmatprep.subr.bf16.mxu0 %v1105_v1 }
 0x10e   : > { %922 = vmatpush3.bf16.msra.mxu1 %v1260_v8  ;;  %948 = vmatpush3.bf16.msra.mxu0 %v1260_v8 }
 0x10f   : > { %923 = vmatprep.subr.bf16.mxu1 %v1105_v1  ;;  %949 = vmatprep.subr.bf16.mxu0 %v1105_v1 }
 0x112   : > { %924 = vmatpush3.bf16.msra.mxu1 %v1269_v9  ;;  %950 = vmatpush3.bf16.msra.mxu0 %v1269_v9 }
 0x113   : > { %925 = vmatprep.subr.bf16.mxu1 %v1105_v1  ;;  %951 = vmatprep.subr.bf16.mxu0 %v1105_v1 }
 0x116   : > { %926 = vmatpush3.bf16.msra.mxu1 %v1278_v10  ;;  %952 = vmatpush3.bf16.msra.mxu0 %v1278_v10 }
 0x117   : > { %927 = vmatprep.subr.bf16.mxu1 %v1105_v1  ;;  %953 = vmatprep.subr.bf16.mxu0 %v1105_v1 }
 0x11a   : > { %928 = vmatpush3.bf16.msra.mxu1 %v1024_v11  ;;  %954 = vmatpush3.bf16.msra.mxu0 %v1024_v11 }
 0x1c8   : > { %v416_v30 = vpop.f32.mrb[4].mxu1  ;;  %v504_v31 = vpop.f32.mrb[4].mxu0 }
 0x1c9   : > { %v417_v32 = vadd.f32 %v791_v29, %v416_v30  ;;  %v505_v33 = vadd.f32 %v791_v29, %v504_v31  ;;  %v879_v34 = vpop.f32.mrb[5].mxu1  ;;  %v905_v35 = vpop.f32.mrb[5].mxu0 }
 0x1ca   : > { %v419_v36 = vpop.f32.mrb[6].mxu1  ;;  %v507_v37 = vpop.f32.mrb[6].mxu0 }
 0x1cb   : > { %v422_v38 = vmax.f32 %v417_v32, 0.0  ;;  %v510_v39 = vmax.f32 %v505_v33, 0.0  ;;  %v880_v40 = vpop.f32.mrb[7].mxu1  ;;  %v906_v41 = vpop.f32.mrb[7].mxu0 }
 0x1cd   : > { %v511_v42 = vmax.f32 %v422_v38, %v510_v39 }
 0x1d0   : > { %v551_v43 = vpop.f32.mrb[8].mxu1  ;;  %v640_v44 = vpop.f32.mrb[8].mxu0 }
 0x1d1   : > { %v552_v45 = vadd.f32 %v1294_v12, %v551_v43  ;;  %v641_v46 = vadd.f32 %v1294_v12, %v640_v44  ;;  %v911_v47 = vpop.f32.mrb[9].mxu1  ;;  %v937_v48 = vpop.f32.mrb[9].mxu0 }
 0x1d2   : > { %v554_v49 = vpop.f32.mrb[10].mxu1  ;;  %v643_v50 = vpop.f32.mrb[10].mxu0 }
 0x1d3   : > { %v557_v51 = vmax.f32 %v552_v45, 0.0  ;;  %v646_v52 = vmax.f32 %v641_v46, 0.0  ;;  %v912_v53 = vpop.f32.mrb[11].mxu1  ;;  %v938_v54 = vpop.f32.mrb[11].mxu0 }
 0x1d5   : > { %v558_v55 = vpack.c.bf16 %v557_v51, %v557_v51  ;;  %v647_v56 = vpack.c.bf16 %v646_v52, %v646_v52 }
 0x1d7   : > { %930 = vmatmul.mubr.bf16.vlgmr.msra.gmra.mrb[12].mxu1 %v558_v55  ;;  %956 = vmatmul.mubr.bf16.vlgmr.msra.gmra.mrb[12].mxu0 %v647_v56 }
 0x2aa   : > { %v593_v57 = vpop.f32.mrb[12].mxu1  ;;  %v682_v58 = vpop.f32.mrb[12].mxu0 }
 0x2ab   : > { %v594_v59 = vadd.f32 %v791_v29, %v593_v57  ;;  %v683_v60 = vadd.f32 %v791_v29, %v682_v58  ;;  %v931_v61 = vpop.f32.mrb[13].mxu1  ;;  %v957_v62 = vpop.f32.mrb[13].mxu0 }
 0x2ac   : > { %v596_v63 = vpop.f32.mrb[14].mxu1  ;;  %v685_v0 = vpop.f32.mrb[14].mxu0 }
 0x2ad   : > { %v599_v1 = vmax.f32 %v594_v59, 0.0  ;;  %v688_v2 = vmax.f32 %v683_v60, 0.0  ;;  %v932_v3 = vpop.f32.mrb[15].mxu1  ;;  %v958_v4 = vpop.f32.mrb[15].mxu0 }
 0x2af   : > { %v600_v5 = vmax.f32 %v511_v42, %v599_v1 }
 0x2b1   : > { %v689_v6 = vmax.f32 %v600_v5, %v688_v2 }
 0x2b3   : > { %690 = vst [vmem:[%s239_s7] sm:$0xff] %v689_v6 }
 0x2b4   : > { %1038 = shalt.err (!%p1035_p5)
}
 0x2b5   : > { %s1039_s17 = scalar_lea.hbm %s1352_s11, 128  ;;  %s1043_s25 = scalar_lea.hbm %s1404_s5, 256 }
 0x2b6   : > { %p1040_p6 = scmp.ne.s32.totalorder %s1352_s11, %s1039_s17  ;;  %p1044_p10 = scmp.lt.u32.totalorder %s1352_s11, %s1404_s5 }
 0x2b7   : > { %p1045_p11 = scmp.lt.u32.totalorder %s1043_s25, %s1039_s17  ;;  %p1047_p13 = scmp.lt.u32.totalorder %s1039_s17, %s1352_s11 }
 0x2b8   : > { %p1041_p7 = pnand %p1040_p6, %p1178_p4 }
 0x2b9   : > { %p1046_p12 = por %p1045_p11, %p1044_p10 }
 0x2ba   : > { %p1042_p9 = pneg %p1041_p7 }
 0x2bb   : > { %p1048_p0 = por %p1047_p13, %p1046_p12 }
 0x2bd   : > { %p1049_p1 = pnand %p1048_p0, %p1042_p9 }
 0x2bf   : > { %1052 = shalt.err (!%p1049_p1)
}
 0x2c0   : > { %959 = dma.vmem_to_hbm [thread:$0]  (%p1178_p4), %s1354_s8, 128, %s1352_s11, %s692_s12  }
 0x2c1 PF: > { %p965_p2 = scmp.ge.s32.totalorder %s1103_s23, 2  ;;  %s718_s7 = sand.u32 1, %s1083_s18  }
 0x2c2   : > { %s719_s9 = scalar_lea.sflag [#allocation3], %s718_s7 }
 0x2c3   : > { %p962_p3 = pnand %p965_p2, %p1185_p8 }
 0x2c5   : > { %1078 = dma.done.wait (!%p962_p3), %s719_s9, 128  }
 0x2c6   : > { %1080 = vsyncadd (!%p962_p3), %s719_s9, 4294967168  ;;  %s18_s23 = sadd.s32 1, %s1103_s23   ;;  %s1407_s18 = smov %s1087_s19 }
 0x2c7   : > { %p15_p5 = scmp.ge.s32.totalorder %s18_s23, 4   ;;  %s1408_s19 = smov %s1091_s20 }
 0x2c8   : > { %s1409_s20 = smov %s1191_s6  ;;  %s1410_s21 = smov %s1099_s22 }
 0x2c9   : > { %s1411_s22 = smov %s1413_s26  ;;  %17 = sbr.rel (!%p15_p5) target bundleno = 4 (0x4), region = 78 }
 0x2d0   :  { %724 = vsyncpa [#allocation3], 1 }
 0x2d1   :  { %726 = vsyncpa [#allocation3 + $0x1], 1 }

</bundles_post_ra>
